<compile_context>
chip_gen: v7x
topology: tpu7x:2x2x1
jax: 0.10.0
libtpu: 0.0.40
codegen_flags: <defaults>
</compile_context>

<pallas_src>
import math

import numpy as np
import jax
import jax.numpy as jnp
from jax import lax
from jax.experimental import pallas as pl
from jax.experimental.pallas import tpu as pltpu

K = 9                  # 9x9 conv
PAD = 8 // 2           # padding=4 -> same spatial size
F = 2                  # 'interp' task -> 2 frames
C = 3                  # channels per frame
CIN = C * F            # 6
CPAD = 8               # input channels zero-padded 6 -> 8
KWC = K * CPAD         # 72 kw-im2col columns per padded row (kw*8 + ci)
GRP = 128              # lane-aligned width of one kh group in the in-kernel im2col
KCOL = K * GRP         # 1152 = contraction depth of the folded conv1 GEMM
CMID = 64
COUT = 3
HALO = K - 1           # 8 extra padded rows needed below each row tile


# ---------------------------------------------------------------------------
# Pallas kernel: one grid step = one (batch, row-tile).  Everything fused.
# ---------------------------------------------------------------------------
def _make_kernel(width, tpx):
    zpad = GRP - KWC  # 56 zero lanes per kh group

    def kernel(xb_ref, xt_ref, w1_ref, b1_ref, w2_ref, b2_ref,
               w3_ref, b3_ref, rm_ref, o_ref, col_ref):
        # ---- build the (tpx, 9*128) im2col slab with aligned copies --------
        # col[p, kh*128 + (kw*8+ci)] = padded_input[row(p)+kh, col(p)+kw, ci]
        for kh in range(K):
            shift = kh * width          # row shift, multiple of 8 sublanes
            nb = tpx - shift            # rows sourced from the body block
            if nb > 0:
                part = xb_ref[0, shift:shift + nb, :]                 # (nb, 72)
                col_ref[0:nb, kh * GRP:(kh + 1) * GRP] = jnp.concatenate(
                    [part, jnp.zeros((nb, zpad), jnp.bfloat16)], axis=-1)
            if shift > 0:               # remaining rows come from the halo tail
                part = xt_ref[0, 0:shift, :]                          # (shift, 72)
                col_ref[nb:tpx, kh * GRP:(kh + 1) * GRP] = jnp.concatenate(
                    [part, jnp.zeros((shift, zpad), jnp.bfloat16)], axis=-1)

        # ---- conv_3x2_64_9x9: single K=1152 GEMM, f32 accumulation ---------
        acc = jnp.dot(col_ref[...], w1_ref[...],
                      preferred_element_type=jnp.float32)             # (tpx, 64)
        h = jnp.maximum(acc + b1_ref[...], 0.0)                       # f32 VPU

        # ---- conv_64_64_1x1 + relu -----------------------------------------
        h = jnp.dot(h.astype(jnp.bfloat16), w2_ref[...],
                    preferred_element_type=jnp.float32)
        h = jnp.maximum(h + b2_ref[...], 0.0)

        # ---- conv_64_3_1x1, transposed so the result is lane-dense (3, tpx)
        hb = h.astype(jnp.bfloat16)
        y = lax.dot_general(w3_ref[...], hb,
                            dimension_numbers=(((1,), (1,)), ((), ())),
                            preferred_element_type=jnp.float32)       # (3, tpx)

        # ---- frame-mean residual from the centre tap (kh=4 group, kw=4) ----
        center = col_ref[:, PAD * GRP:(PAD + 1) * GRP]                # (tpx, 128)
        res = lax.dot_general(rm_ref[...], center,
                              dimension_numbers=(((1,), (1,)), ((), ())),
                              preferred_element_type=jnp.float32)     # (3, tpx)

        o_ref[0] = y + b3_ref[...] + res                              # (3, tpx) f32

    return kernel


# ---------------------------------------------------------------------------
# Tile selection: largest row tile under a VMEM budget, keep >= 2 grid steps.
# ---------------------------------------------------------------------------
def _vmem_estimate(tpx, width):
    halo_px = HALO * width
    bytes_in = 2 * (tpx + halo_px) * GRP * 2       # double-buffered body + tail (bf16, lane-padded)
    bytes_col = tpx * KCOL * 2                      # im2col scratch (bf16)
    bytes_mid = 3 * tpx * GRP * 4                   # f32 intermediates (lane-padded), rough
    bytes_out = 2 * 8 * tpx * 4                     # output block, 3->8 sublane pad, double-buffered
    bytes_w = 2 * (KCOL * CMID + 3 * CMID * CMID) * 2
    return bytes_in + bytes_col + bytes_mid + bytes_out + bytes_w + (2 << 20)


def _choose_tile_rows(B, H, W, max_pixels, vmem_budget):
    cands = [th for th in range(8, H + 1, 8)
             if H % th == 0 and ((th * W) % 128 == 0 or th * W == H * W)]
    if not cands:
        raise ValueError("no legal row tile (need H, W multiples of 8)")
    ok = [th for th in cands
          if th * W <= max_pixels and _vmem_estimate(th * W, W) <= vmem_budget]
    if not ok:
        ok = [min(cands)]
    # keep at least 2 parallel grid steps when possible (v7x megacore sharding)
    multi = [th for th in ok if B * (H // th) >= 2]
    pool = multi if multi else ok
    return max(pool)


# ---------------------------------------------------------------------------
# Wrapper (layout glue only: NHWC, bf16 cast, channel pad, kw-im2col, reshape)
# ---------------------------------------------------------------------------
def resnet_forward(frames, params, *, tile_rows=None, max_tile_pixels=8192,
                   vmem_budget_bytes=40 * 1024 * 1024):
    B, Fr, Cc, H, W = frames.shape
    assert (Fr, Cc) == (F, C), "this script instantiates the 'interp' task"
    assert H % 8 == 0 and W % 8 == 0, "spatial dims must be multiples of 8"
    HW = H * W

    TH = tile_rows if tile_rows is not None else _choose_tile_rows(
        B, H, W, max_tile_pixels, vmem_budget_bytes)
    assert H % TH == 0 and TH % 8 == 0, "tile_rows must divide H, multiple of 8"
    assert (TH * W) % 128 == 0 or TH * W == HW, "tile must be lane-aligned"
    TPX = TH * W

    # torch.cat over frames == reshape (B, F*C, H, W); NHWC, bf16 BEFORE pad,
    # zero-pad channels 6->8 and spatial by 4; 9x kw-im2col (kw*8 + ci).
    x = frames.reshape(B, CIN, H, W).transpose(0, 2, 3, 1).astype(jnp.bfloat16)
    xp = jnp.pad(x, ((0, 0), (PAD, PAD), (PAD, PAD), (0, CPAD - CIN)))
    xrow = jnp.concatenate([xp[:, :, kw:kw + W, :] for kw in range(K)], axis=-1)
    xrow = xrow.reshape(B, (H + HALO) * W, KWC)                       # (B,(H+8)W,72) bf16

    est = _vmem_estimate(TPX, W)
    vmem_limit = int(min(max(est + (8 << 20), 32 << 20), 48 << 20))

    grid = (B, H // TH)
    kernel = _make_kernel(W, TPX)

    out = pl.pallas_call(
        kernel,
        out_shape=jax.ShapeDtypeStruct((B, COUT, HW), jnp.float32),
        grid_spec=pltpu.PrefetchScalarGridSpec(
            num_scalar_prefetch=0,
            grid=grid,
            in_specs=[
                # body: padded rows [t*TH, (t+1)*TH)
                pl.BlockSpec((1, TPX, KWC), lambda b, t: (b, t, 0)),
                # halo tail: padded rows [(t+1)*TH, (t+1)*TH + 8)
                pl.BlockSpec((1, HALO * W, KWC),
                             lambda b, t: (b, (t + 1) * (TH // 8), 0)),
                pl.BlockSpec((KCOL, CMID), lambda b, t: (0, 0)),       # w1 (1152,64)
                pl.BlockSpec((1, CMID), lambda b, t: (0, 0)),          # b1
                pl.BlockSpec((CMID, CMID), lambda b, t: (0, 0)),       # w2
                pl.BlockSpec((1, CMID), lambda b, t: (0, 0)),          # b2
                pl.BlockSpec((COUT, CMID), lambda b, t: (0, 0)),       # w3 (3,64)
                pl.BlockSpec((COUT, 1), lambda b, t: (0, 0)),          # b3 (3,1)
                pl.BlockSpec((COUT, GRP), lambda b, t: (0, 0)),        # rmat (3,128)
            ],
            out_specs=pl.BlockSpec((1, COUT, TPX), lambda b, t: (b, 0, t)),
            scratch_shapes=[pltpu.VMEM((TPX, KCOL), jnp.bfloat16)],    # im2col slab
        ),
        compiler_params=pltpu.CompilerParams(
            dimension_semantics=("parallel", "parallel"),
            vmem_limit_bytes=vmem_limit,
        ),
    )(xrow, xrow, params["w1k"], params["b1"], params["w2k"], params["b2"],
      params["w3k"], params["b3"], params["rmat"])

    # (B, 3, H*W) is already NCHW-ordered; just reshape.
    return out.reshape(B, COUT, H, W)


# ---------------------------------------------------------------------------
# Deterministic parameter init (PyTorch Conv2d default: U(-1/sqrt(fan_in), ..))
# ---------------------------------------------------------------------------
def init_params(key):
    def conv_init(k, cout, cin, kh, kw):
        kw_key, kb_key = jax.random.split(k)
        bound = 1.0 / math.sqrt(cin * kh * kw)
        w = jax.random.uniform(kw_key, (cout, cin, kh, kw), jnp.float32, -bound, bound)
        b = jax.random.uniform(kb_key, (cout,), jnp.float32, -bound, bound)
        return w, b

    k1, k2, k3 = jax.random.split(key, 3)
    w1, b1 = conv_init(k1, CMID, CIN, K, K)     # conv_3x2_64_9x9
    w2, b2 = conv_init(k2, CMID, CMID, 1, 1)    # conv_64_64_1x1
    w3, b3 = conv_init(k3, COUT, CMID, 1, 1)    # conv_64_3_1x1
    # TODO(synk): only the 'interp' branch is instantiated; 'denoise'/'sr' would add
    #             the 21-channel 9x9 conv and the extra 64->64 9x9 conv analogously.

    torch_shaped = dict(w1=w1, b1=b1, w2=w2, b2=b2, w3=w3, b3=b3)

    # conv1 weights folded for the single K=1152 GEMM:
    # row index = kh*128 + (kw*8 + ci); rows 72..127 of each group are zero.
    w1p = jnp.pad(w1, ((0, 0), (0, CPAD - CIN), (0, 0), (0, 0)))        # (64,8,9,9)
    w1k = jnp.transpose(w1p, (2, 3, 1, 0)).reshape(K, KWC, CMID)        # (9,72,64)
    w1k = jnp.pad(w1k, ((0, 0), (0, GRP - KWC), (0, 0))).reshape(KCOL, CMID)

    # residual matrix: picks centre-tap (kw=PAD) channels, averages the frames
    rmat = np.zeros((COUT, GRP), np.float32)
    for o in range(COUT):
        for fr in range(F):
            rmat[o, PAD * CPAD + fr * C + o] = 1.0 / F

    kernel_shaped = dict(
        w1k=w1k.astype(jnp.bfloat16),                                   # (1152, 64)
        b1=b1.reshape(1, CMID).astype(jnp.float32),
        w2k=jnp.transpose(w2[:, :, 0, 0], (1, 0)).astype(jnp.bfloat16),  # (cin, cout)
        b2=b2.reshape(1, CMID).astype(jnp.float32),
        w3k=w3[:, :, 0, 0].astype(jnp.bfloat16),                         # (3, 64)
        b3=b3.reshape(COUT, 1).astype(jnp.float32),
        rmat=jnp.asarray(rmat, jnp.bfloat16),                            # (3, 128)
    )
    return torch_shaped, kernel_shaped


# ---------------------------------------------------------------------------
# Pure-JAX reference of the PyTorch forward (for a sanity check)
# ---------------------------------------------------------------------------
def reference_forward(frames, tw):
    B, Fr, Cc, H, W = frames.shape
    aver = frames.mean(axis=1)                         # (B, 3, H, W)
    x = frames.reshape(B, Fr * Cc, H, W)

    def conv(inp, w, b, pad):
        y = lax.conv_general_dilated(
            inp, w, window_strides=(1, 1), padding=[(pad, pad), (pad, pad)],
            dimension_numbers=("NCHW", "OIHW", "NCHW"),
            precision=lax.Precision.HIGHEST)
        return y + b[None, :, None, None]

    h = jax.nn.relu(conv(x, tw["w1"], tw["b1"], PAD))
    h = jax.nn.relu(conv(h, tw["w2"], tw["b2"], 0))
    return conv(h, tw["w3"], tw["b3"], 0) + aver


if __name__ == "__main__":
    key = jax.random.PRNGKey(0)
    k_param, k_data = jax.random.split(key)

    torch_params, kernel_params = init_params(k_param)

    B, H, W = 2, 16, 16
    frames = jax.random.normal(k_data, (B, F, C, H, W), jnp.float32)

    # tile_rows=8 -> grid (2, 2): exercises the row-tiling + halo + tail path.
    fwd = jax.jit(lambda fr: resnet_forward(fr, kernel_params, tile_rows=8))
    out = jax.block_until_ready(fwd(frames))

    ref = jax.block_until_ready(reference_forward(frames, torch_params))
    max_err = float(jnp.max(jnp.abs(out - ref)))
    assert out.shape == (B, COUT, H, W), out.shape
    # bf16 matmul operands + bf16 centre-tap residual => worst-case abs err ~1e-2.
    assert max_err < 5e-2, f"mismatch vs reference: max abs err = {max_err}"

    print("KERNEL_OK")
</pallas_src>

<mosaic_0001>
module attributes {stable_mosaic.version = 11 : i64} {
  func.func @kernel(%arg0: i32, %arg1: i32, %arg2: memref<1x128x72xbf16, #tpu.memory_space<vmem>>, %arg3: memref<1x128x72xbf16, #tpu.memory_space<vmem>>, %arg4: memref<1152x64xbf16, #tpu.memory_space<vmem>>, %arg5: memref<1x64xf32, #tpu.memory_space<vmem>>, %arg6: memref<64x64xbf16, #tpu.memory_space<vmem>>, %arg7: memref<1x64xf32, #tpu.memory_space<vmem>>, %arg8: memref<3x64xbf16, #tpu.memory_space<vmem>>, %arg9: memref<3x1xf32, #tpu.memory_space<vmem>>, %arg10: memref<3x128xbf16, #tpu.memory_space<vmem>>, %arg11: memref<1x3x128xf32, #tpu.memory_space<vmem>>, %arg12: memref<128x1152xbf16, #tpu.memory_space<vmem>>) attributes {dimension_semantics = [#tpu.dimension_semantics<parallel>, #tpu.dimension_semantics<parallel>], iteration_bounds = array<i64: 2, 2>, scalar_prefetch = 0 : i64, scratch_operands = 1 : i64, tpu.core_type = #tpu.core_type<tc>, window_params = [{transform_indices = @transform_0, window_bounds = array<i64: 1, 128, 72>}, {transform_indices = @transform_1, window_bounds = array<i64: 1, 128, 72>}, {pipeline_mode = #tpu.pipeline_mode<synchronous>, transform_indices = @transform_2, window_bounds = array<i64: 1152, 64>}, {pipeline_mode = #tpu.pipeline_mode<synchronous>, transform_indices = @transform_3, window_bounds = array<i64: 1, 64>}, {pipeline_mode = #tpu.pipeline_mode<synchronous>, transform_indices = @transform_4, window_bounds = array<i64: 64, 64>}, {pipeline_mode = #tpu.pipeline_mode<synchronous>, transform_indices = @transform_5, window_bounds = array<i64: 1, 64>}, {pipeline_mode = #tpu.pipeline_mode<synchronous>, transform_indices = @transform_6, window_bounds = array<i64: 3, 64>}, {pipeline_mode = #tpu.pipeline_mode<synchronous>, transform_indices = @transform_7, window_bounds = array<i64: 3, 1>}, {pipeline_mode = #tpu.pipeline_mode<synchronous>, transform_indices = @transform_8, window_bounds = array<i64: 3, 128>}, {transform_indices = @transform_9, window_bounds = array<i64: 1, 3, 128>}]} {
    %c0 = arith.constant 0 : index
    %c0_0 = arith.constant 0 : index
    %c0_1 = arith.constant 0 : index
    %0 = vector.load %arg2[%c0, %c0_0, %c0_1] : memref<1x128x72xbf16, #tpu.memory_space<vmem>>, vector<1x128x72xbf16>
    %1 = vector.shape_cast %0 : vector<1x128x72xbf16> to vector<128x72xbf16>
    %cst = arith.constant 0.000000e+00 : bf16
    %2 = vector.broadcast %cst : bf16 to vector<128x56xbf16>
    %3 = tpu.concatenate %1, %2 in 1 : vector<128x72xbf16>, vector<128x56xbf16> -> vector<128x128xbf16>
    %c0_2 = arith.constant 0 : index
    %c0_3 = arith.constant 0 : index
    %4 = vector.load %arg12[%c0_2, %c0_3] : memref<128x1152xbf16, #tpu.memory_space<vmem>>, vector<128x128xbf16>
    tpu.vector_store %arg12[%c0_2, %c0_3], %3 {strides = array<i32>} : memref<128x1152xbf16, #tpu.memory_space<vmem>>, vector<128x128xbf16>,
    %c0_4 = arith.constant 0 : index
    %c16 = arith.constant 16 : index
    %c0_5 = arith.constant 0 : index
    %5 = vector.load %arg2[%c0_4, %c16, %c0_5] : memref<1x128x72xbf16, #tpu.memory_space<vmem>>, vector<1x112x72xbf16>
    %6 = vector.shape_cast %5 : vector<1x112x72xbf16> to vector<112x72xbf16>
    %cst_6 = arith.constant 0.000000e+00 : bf16
    %7 = vector.broadcast %cst_6 : bf16 to vector<112x56xbf16>
    %8 = tpu.concatenate %6, %7 in 1 : vector<112x72xbf16>, vector<112x56xbf16> -> vector<112x128xbf16>
    %c0_7 = arith.constant 0 : index
    %c128 = arith.constant 128 : index
    %9 = vector.load %arg12[%c0_7, %c128] : memref<128x1152xbf16, #tpu.memory_space<vmem>>, vector<112x128xbf16>
    tpu.vector_store %arg12[%c0_7, %c128], %8 {strides = array<i32>} : memref<128x1152xbf16, #tpu.memory_space<vmem>>, vector<112x128xbf16>,
    %c0_8 = arith.constant 0 : index
    %c0_9 = arith.constant 0 : index
    %c0_10 = arith.constant 0 : index
    %10 = vector.load %arg3[%c0_8, %c0_9, %c0_10] : memref<1x128x72xbf16, #tpu.memory_space<vmem>>, vector<1x16x72xbf16>
    %11 = vector.shape_cast %10 : vector<1x16x72xbf16> to vector<16x72xbf16>
    %cst_11 = arith.constant 0.000000e+00 : bf16
    %12 = vector.broadcast %cst_11 : bf16 to vector<16x56xbf16>
    %13 = tpu.concatenate %11, %12 in 1 : vector<16x72xbf16>, vector<16x56xbf16> -> vector<16x128xbf16>
    %c112 = arith.constant 112 : index
    %c128_12 = arith.constant 128 : index
    %14 = vector.load %arg12[%c112, %c128_12] : memref<128x1152xbf16, #tpu.memory_space<vmem>>, vector<16x128xbf16>
    tpu.vector_store %arg12[%c112, %c128_12], %13 {strides = array<i32>} : memref<128x1152xbf16, #tpu.memory_space<vmem>>, vector<16x128xbf16>,
    %c0_13 = arith.constant 0 : index
    %c32 = arith.constant 32 : index
    %c0_14 = arith.constant 0 : index
    %15 = vector.load %arg2[%c0_13, %c32, %c0_14] : memref<1x128x72xbf16, #tpu.memory_space<vmem>>, vector<1x96x72xbf16>
    %16 = vector.shape_cast %15 : vector<1x96x72xbf16> to vector<96x72xbf16>
    %cst_15 = arith.constant 0.000000e+00 : bf16
    %17 = vector.broadcast %cst_15 : bf16 to vector<96x56xbf16>
    %18 = tpu.concatenate %16, %17 in 1 : vector<96x72xbf16>, vector<96x56xbf16> -> vector<96x128xbf16>
    %c0_16 = arith.constant 0 : index
    %c256 = arith.constant 256 : index
    %19 = vector.load %arg12[%c0_16, %c256] : memref<128x1152xbf16, #tpu.memory_space<vmem>>, vector<96x128xbf16>
    tpu.vector_store %arg12[%c0_16, %c256], %18 {strides = array<i32>} : memref<128x1152xbf16, #tpu.memory_space<vmem>>, vector<96x128xbf16>,
    %c0_17 = arith.constant 0 : index
    %c0_18 = arith.constant 0 : index
    %c0_19 = arith.constant 0 : index
    %20 = vector.load %arg3[%c0_17, %c0_18, %c0_19] : memref<1x128x72xbf16, #tpu.memory_space<vmem>>, vector<1x32x72xbf16>
    %21 = vector.shape_cast %20 : vector<1x32x72xbf16> to vector<32x72xbf16>
    %cst_20 = arith.constant 0.000000e+00 : bf16
    %22 = vector.broadcast %cst_20 : bf16 to vector<32x56xbf16>
    %23 = tpu.concatenate %21, %22 in 1 : vector<32x72xbf16>, vector<32x56xbf16> -> vector<32x128xbf16>
    %c96 = arith.constant 96 : index
    %c256_21 = arith.constant 256 : index
    %24 = vector.load %arg12[%c96, %c256_21] : memref<128x1152xbf16, #tpu.memory_space<vmem>>, vector<32x128xbf16>
    tpu.vector_store %arg12[%c96, %c256_21], %23 {strides = array<i32>} : memref<128x1152xbf16, #tpu.memory_space<vmem>>, vector<32x128xbf16>,
    %c0_22 = arith.constant 0 : index
    %c48 = arith.constant 48 : index
    %c0_23 = arith.constant 0 : index
    %25 = vector.load %arg2[%c0_22, %c48, %c0_23] : memref<1x128x72xbf16, #tpu.memory_space<vmem>>, vector<1x80x72xbf16>
    %26 = vector.shape_cast %25 : vector<1x80x72xbf16> to vector<80x72xbf16>
    %cst_24 = arith.constant 0.000000e+00 : bf16
    %27 = vector.broadcast %cst_24 : bf16 to vector<80x56xbf16>
    %28 = tpu.concatenate %26, %27 in 1 : vector<80x72xbf16>, vector<80x56xbf16> -> vector<80x128xbf16>
    %c0_25 = arith.constant 0 : index
    %c384 = arith.constant 384 : index
    %29 = vector.load %arg12[%c0_25, %c384] : memref<128x1152xbf16, #tpu.memory_space<vmem>>, vector<80x128xbf16>
    tpu.vector_store %arg12[%c0_25, %c384], %28 {strides = array<i32>} : memref<128x1152xbf16, #tpu.memory_space<vmem>>, vector<80x128xbf16>,
    %c0_26 = arith.constant 0 : index
    %c0_27 = arith.constant 0 : index
    %c0_28 = arith.constant 0 : index
    %30 = vector.load %arg3[%c0_26, %c0_27, %c0_28] : memref<1x128x72xbf16, #tpu.memory_space<vmem>>, vector<1x48x72xbf16>
    %31 = vector.shape_cast %30 : vector<1x48x72xbf16> to vector<48x72xbf16>
    %cst_29 = arith.constant 0.000000e+00 : bf16
    %32 = vector.broadcast %cst_29 : bf16 to vector<48x56xbf16>
    %33 = tpu.concatenate %31, %32 in 1 : vector<48x72xbf16>, vector<48x56xbf16> -> vector<48x128xbf16>
    %c80 = arith.constant 80 : index
    %c384_30 = arith.constant 384 : index
    %34 = vector.load %arg12[%c80, %c384_30] : memref<128x1152xbf16, #tpu.memory_space<vmem>>, vector<48x128xbf16>
    tpu.vector_store %arg12[%c80, %c384_30], %33 {strides = array<i32>} : memref<128x1152xbf16, #tpu.memory_space<vmem>>, vector<48x128xbf16>,
    %c0_31 = arith.constant 0 : index
    %c64 = arith.constant 64 : index
    %c0_32 = arith.constant 0 : index
    %35 = vector.load %arg2[%c0_31, %c64, %c0_32] : memref<1x128x72xbf16, #tpu.memory_space<vmem>>, vector<1x64x72xbf16>
    %36 = vector.shape_cast %35 : vector<1x64x72xbf16> to vector<64x72xbf16>
    %cst_33 = arith.constant 0.000000e+00 : bf16
    %37 = vector.broadcast %cst_33 : bf16 to vector<64x56xbf16>
    %38 = tpu.concatenate %36, %37 in 1 : vector<64x72xbf16>, vector<64x56xbf16> -> vector<64x128xbf16>
    %c0_34 = arith.constant 0 : index
    %c512 = arith.constant 512 : index
    %39 = vector.load %arg12[%c0_34, %c512] : memref<128x1152xbf16, #tpu.memory_space<vmem>>, vector<64x128xbf16>
    tpu.vector_store %arg12[%c0_34, %c512], %38 {strides = array<i32>} : memref<128x1152xbf16, #tpu.memory_space<vmem>>, vector<64x128xbf16>,
    %c0_35 = arith.constant 0 : index
    %c0_36 = arith.constant 0 : index
    %c0_37 = arith.constant 0 : index
    %40 = vector.load %arg3[%c0_35, %c0_36, %c0_37] : memref<1x128x72xbf16, #tpu.memory_space<vmem>>, vector<1x64x72xbf16>
    %41 = vector.shape_cast %40 : vector<1x64x72xbf16> to vector<64x72xbf16>
    %cst_38 = arith.constant 0.000000e+00 : bf16
    %42 = vector.broadcast %cst_38 : bf16 to vector<64x56xbf16>
    %43 = tpu.concatenate %41, %42 in 1 : vector<64x72xbf16>, vector<64x56xbf16> -> vector<64x128xbf16>
    %c64_39 = arith.constant 64 : index
    %c512_40 = arith.constant 512 : index
    %44 = vector.load %arg12[%c64_39, %c512_40] : memref<128x1152xbf16, #tpu.memory_space<vmem>>, vector<64x128xbf16>
    tpu.vector_store %arg12[%c64_39, %c512_40], %43 {strides = array<i32>} : memref<128x1152xbf16, #tpu.memory_space<vmem>>, vector<64x128xbf16>,
    %c0_41 = arith.constant 0 : index
    %c80_42 = arith.constant 80 : index
    %c0_43 = arith.constant 0 : index
    %45 = vector.load %arg2[%c0_41, %c80_42, %c0_43] : memref<1x128x72xbf16, #tpu.memory_space<vmem>>, vector<1x48x72xbf16>
    %46 = vector.shape_cast %45 : vector<1x48x72xbf16> to vector<48x72xbf16>
    %cst_44 = arith.constant 0.000000e+00 : bf16
    %47 = vector.broadcast %cst_44 : bf16 to vector<48x56xbf16>
    %48 = tpu.concatenate %46, %47 in 1 : vector<48x72xbf16>, vector<48x56xbf16> -> vector<48x128xbf16>
    %c0_45 = arith.constant 0 : index
    %c640 = arith.constant 640 : index
    %49 = vector.load %arg12[%c0_45, %c640] : memref<128x1152xbf16, #tpu.memory_space<vmem>>, vector<48x128xbf16>
    tpu.vector_store %arg12[%c0_45, %c640], %48 {strides = array<i32>} : memref<128x1152xbf16, #tpu.memory_space<vmem>>, vector<48x128xbf16>,
    %c0_46 = arith.constant 0 : index
    %c0_47 = arith.constant 0 : index
    %c0_48 = arith.constant 0 : index
    %50 = vector.load %arg3[%c0_46, %c0_47, %c0_48] : memref<1x128x72xbf16, #tpu.memory_space<vmem>>, vector<1x80x72xbf16>
    %51 = vector.shape_cast %50 : vector<1x80x72xbf16> to vector<80x72xbf16>
    %cst_49 = arith.constant 0.000000e+00 : bf16
    %52 = vector.broadcast %cst_49 : bf16 to vector<80x56xbf16>
    %53 = tpu.concatenate %51, %52 in 1 : vector<80x72xbf16>, vector<80x56xbf16> -> vector<80x128xbf16>
    %c48_50 = arith.constant 48 : index
    %c640_51 = arith.constant 640 : index
    %54 = vector.load %arg12[%c48_50, %c640_51] : memref<128x1152xbf16, #tpu.memory_space<vmem>>, vector<80x128xbf16>
    tpu.vector_store %arg12[%c48_50, %c640_51], %53 {strides = array<i32>} : memref<128x1152xbf16, #tpu.memory_space<vmem>>, vector<80x128xbf16>,
    %c0_52 = arith.constant 0 : index
    %c96_53 = arith.constant 96 : index
    %c0_54 = arith.constant 0 : index
    %55 = vector.load %arg2[%c0_52, %c96_53, %c0_54] : memref<1x128x72xbf16, #tpu.memory_space<vmem>>, vector<1x32x72xbf16>
    %56 = vector.shape_cast %55 : vector<1x32x72xbf16> to vector<32x72xbf16>
    %cst_55 = arith.constant 0.000000e+00 : bf16
    %57 = vector.broadcast %cst_55 : bf16 to vector<32x56xbf16>
    %58 = tpu.concatenate %56, %57 in 1 : vector<32x72xbf16>, vector<32x56xbf16> -> vector<32x128xbf16>
    %c0_56 = arith.constant 0 : index
    %c768 = arith.constant 768 : index
    %59 = vector.load %arg12[%c0_56, %c768] : memref<128x1152xbf16, #tpu.memory_space<vmem>>, vector<32x128xbf16>
    tpu.vector_store %arg12[%c0_56, %c768], %58 {strides = array<i32>} : memref<128x1152xbf16, #tpu.memory_space<vmem>>, vector<32x128xbf16>,
    %c0_57 = arith.constant 0 : index
    %c0_58 = arith.constant 0 : index
    %c0_59 = arith.constant 0 : index
    %60 = vector.load %arg3[%c0_57, %c0_58, %c0_59] : memref<1x128x72xbf16, #tpu.memory_space<vmem>>, vector<1x96x72xbf16>
    %61 = vector.shape_cast %60 : vector<1x96x72xbf16> to vector<96x72xbf16>
    %cst_60 = arith.constant 0.000000e+00 : bf16
    %62 = vector.broadcast %cst_60 : bf16 to vector<96x56xbf16>
    %63 = tpu.concatenate %61, %62 in 1 : vector<96x72xbf16>, vector<96x56xbf16> -> vector<96x128xbf16>
    %c32_61 = arith.constant 32 : index
    %c768_62 = arith.constant 768 : index
    %64 = vector.load %arg12[%c32_61, %c768_62] : memref<128x1152xbf16, #tpu.memory_space<vmem>>, vector<96x128xbf16>
    tpu.vector_store %arg12[%c32_61, %c768_62], %63 {strides = array<i32>} : memref<128x1152xbf16, #tpu.memory_space<vmem>>, vector<96x128xbf16>,
    %c0_63 = arith.constant 0 : index
    %c112_64 = arith.constant 112 : index
    %c0_65 = arith.constant 0 : index
    %65 = vector.load %arg2[%c0_63, %c112_64, %c0_65] : memref<1x128x72xbf16, #tpu.memory_space<vmem>>, vector<1x16x72xbf16>
    %66 = vector.shape_cast %65 : vector<1x16x72xbf16> to vector<16x72xbf16>
    %cst_66 = arith.constant 0.000000e+00 : bf16
    %67 = vector.broadcast %cst_66 : bf16 to vector<16x56xbf16>
    %68 = tpu.concatenate %66, %67 in 1 : vector<16x72xbf16>, vector<16x56xbf16> -> vector<16x128xbf16>
    %c0_67 = arith.constant 0 : index
    %c896 = arith.constant 896 : index
    %69 = vector.load %arg12[%c0_67, %c896] : memref<128x1152xbf16, #tpu.memory_space<vmem>>, vector<16x128xbf16>
    tpu.vector_store %arg12[%c0_67, %c896], %68 {strides = array<i32>} : memref<128x1152xbf16, #tpu.memory_space<vmem>>, vector<16x128xbf16>,
    %c0_68 = arith.constant 0 : index
    %c0_69 = arith.constant 0 : index
    %c0_70 = arith.constant 0 : index
    %70 = vector.load %arg3[%c0_68, %c0_69, %c0_70] : memref<1x128x72xbf16, #tpu.memory_space<vmem>>, vector<1x112x72xbf16>
    %71 = vector.shape_cast %70 : vector<1x112x72xbf16> to vector<112x72xbf16>
    %cst_71 = arith.constant 0.000000e+00 : bf16
    %72 = vector.broadcast %cst_71 : bf16 to vector<112x56xbf16>
    %73 = tpu.concatenate %71, %72 in 1 : vector<112x72xbf16>, vector<112x56xbf16> -> vector<112x128xbf16>
    %c16_72 = arith.constant 16 : index
    %c896_73 = arith.constant 896 : index
    %74 = vector.load %arg12[%c16_72, %c896_73] : memref<128x1152xbf16, #tpu.memory_space<vmem>>, vector<112x128xbf16>
    tpu.vector_store %arg12[%c16_72, %c896_73], %73 {strides = array<i32>} : memref<128x1152xbf16, #tpu.memory_space<vmem>>, vector<112x128xbf16>,
    %c0_74 = arith.constant 0 : index
    %c0_75 = arith.constant 0 : index
    %c0_76 = arith.constant 0 : index
    %75 = vector.load %arg3[%c0_74, %c0_75, %c0_76] : memref<1x128x72xbf16, #tpu.memory_space<vmem>>, vector<1x128x72xbf16>
    %76 = vector.shape_cast %75 : vector<1x128x72xbf16> to vector<128x72xbf16>
    %cst_77 = arith.constant 0.000000e+00 : bf16
    %77 = vector.broadcast %cst_77 : bf16 to vector<128x56xbf16>
    %78 = tpu.concatenate %76, %77 in 1 : vector<128x72xbf16>, vector<128x56xbf16> -> vector<128x128xbf16>
    %c0_78 = arith.constant 0 : index
    %c1024 = arith.constant 1024 : index
    %79 = vector.load %arg12[%c0_78, %c1024] : memref<128x1152xbf16, #tpu.memory_space<vmem>>, vector<128x128xbf16>
    tpu.vector_store %arg12[%c0_78, %c1024], %78 {strides = array<i32>} : memref<128x1152xbf16, #tpu.memory_space<vmem>>, vector<128x128xbf16>,
    %c0_79 = arith.constant 0 : index
    %c0_80 = arith.constant 0 : index
    %80 = vector.load %arg12[%c0_79, %c0_80] : memref<128x1152xbf16, #tpu.memory_space<vmem>>, vector<128x1152xbf16>
    %c0_81 = arith.constant 0 : index
    %c0_82 = arith.constant 0 : index
    %81 = vector.load %arg4[%c0_81, %c0_82] : memref<1152x64xbf16, #tpu.memory_space<vmem>>, vector<1152x64xbf16>
    %cst_83 = arith.constant dense<0.000000e+00> : vector<128x64xf32>
    %82 = tpu.matmul %80, %81, %cst_83 {dimension_numbers = #tpu.dot_dimension_numbers<[1], [0], [0], [1], [0, 0, 1, 1], [], []>} : vector<128x1152xbf16>, vector<1152x64xbf16>, vector<128x64xf32> -> vector<128x64xf32>
    %c0_84 = arith.constant 0 : index
    %c0_85 = arith.constant 0 : index
    %83 = vector.load %arg5[%c0_84, %c0_85] : memref<1x64xf32, #tpu.memory_space<vmem>>, vector<1x64xf32>
    %84 = vector.broadcast %83 : vector<1x64xf32> to vector<128x64xf32>
    %85 = arith.addf %82, %84 : vector<128x64xf32>
    %cst_86 = arith.constant 0.000000e+00 : f32
    %86 = vector.broadcast %cst_86 : f32 to vector<128x64xf32>
    %87 = arith.maximumf %85, %86 : vector<128x64xf32>
    %88 = arith.truncf %87 : vector<128x64xf32> to vector<128x64xbf16>
    %c0_87 = arith.constant 0 : index
    %c0_88 = arith.constant 0 : index
    %89 = vector.load %arg6[%c0_87, %c0_88] : memref<64x64xbf16, #tpu.memory_space<vmem>>, vector<64x64xbf16>
    %cst_89 = arith.constant dense<0.000000e+00> : vector<128x64xf32>
    %90 = tpu.matmul %88, %89, %cst_89 {dimension_numbers = #tpu.dot_dimension_numbers<[1], [0], [0], [1], [0, 0, 1, 1], [], []>} : vector<128x64xbf16>, vector<64x64xbf16>, vector<128x64xf32> -> vector<128x64xf32>
    %c0_90 = arith.constant 0 : index
    %c0_91 = arith.constant 0 : index
    %91 = vector.load %arg7[%c0_90, %c0_91] : memref<1x64xf32, #tpu.memory_space<vmem>>, vector<1x64xf32>
    %92 = vector.broadcast %91 : vector<1x64xf32> to vector<128x64xf32>
    %93 = arith.addf %90, %92 : vector<128x64xf32>
    %cst_92 = arith.constant 0.000000e+00 : f32
    %94 = vector.broadcast %cst_92 : f32 to vector<128x64xf32>
    %95 = arith.maximumf %93, %94 : vector<128x64xf32>
    %96 = arith.truncf %95 : vector<128x64xf32> to vector<128x64xbf16>
    %c0_93 = arith.constant 0 : index
    %c0_94 = arith.constant 0 : index
    %97 = vector.load %arg8[%c0_93, %c0_94] : memref<3x64xbf16, #tpu.memory_space<vmem>>, vector<3x64xbf16>
    %cst_95 = arith.constant dense<0.000000e+00> : vector<3x128xf32>
    %98 = tpu.matmul %97, %96, %cst_95 {dimension_numbers = #tpu.dot_dimension_numbers<[1], [1], [0], [0], [0, 0, 1, 0], [], []>} : vector<3x64xbf16>, vector<128x64xbf16>, vector<3x128xf32> -> vector<3x128xf32>
    %c0_96 = arith.constant 0 : index
    %c512_97 = arith.constant 512 : index
    %99 = vector.load %arg12[%c0_96, %c512_97] : memref<128x1152xbf16, #tpu.memory_space<vmem>>, vector<128x128xbf16>
    %c0_98 = arith.constant 0 : index
    %c0_99 = arith.constant 0 : index
    %100 = vector.load %arg10[%c0_98, %c0_99] : memref<3x128xbf16, #tpu.memory_space<vmem>>, vector<3x128xbf16>
    %cst_100 = arith.constant dense<0.000000e+00> : vector<3x128xf32>
    %101 = tpu.matmul %100, %99, %cst_100 {dimension_numbers = #tpu.dot_dimension_numbers<[1], [1], [0], [0], [0, 0, 1, 0], [], []>} : vector<3x128xbf16>, vector<128x128xbf16>, vector<3x128xf32> -> vector<3x128xf32>
    %c0_101 = arith.constant 0 : index
    %c0_102 = arith.constant 0 : index
    %102 = vector.load %arg9[%c0_101, %c0_102] : memref<3x1xf32, #tpu.memory_space<vmem>>, vector<3x1xf32>
    %103 = vector.broadcast %102 : vector<3x1xf32> to vector<3x128xf32>
    %104 = arith.addf %98, %103 : vector<3x128xf32>
    %105 = arith.addf %104, %101 : vector<3x128xf32>
    %c0_103 = arith.constant 0 : index
    %c0_104 = arith.constant 0 : index
    %c0_105 = arith.constant 0 : index
    %106 = vector.load %arg11[%c0_103, %c0_104, %c0_105] : memref<1x3x128xf32, #tpu.memory_space<vmem>>, vector<1x3x128xf32>
    %107 = vector.shape_cast %106 : vector<1x3x128xf32> to vector<3x128xf32>
    %108 = vector.shape_cast %105 : vector<3x128xf32> to vector<1x3x128xf32>
    tpu.vector_store %arg11[%c0_103, %c0_104, %c0_105], %108 {strides = array<i32>} : memref<1x3x128xf32, #tpu.memory_space<vmem>>, vector<1x3x128xf32>,
    return
  }
  func.func @transform_0(%arg0: i32, %arg1: i32) -> (i32, i32, i32) {
    %c0_i32 = arith.constant 0 : i32
    %c0_i32_0 = arith.constant 0 : i32
    return %arg0, %arg1, %c0_i32 : i32, i32, i32
  }
  func.func @transform_1(%arg0: i32, %arg1: i32) -> (i32, i32, i32) {
    %c1_i32 = arith.constant 1 : i32
    %0 = arith.addi %arg1, %c1_i32 : i32
    %c1_i32_0 = arith.constant 1 : i32
    %1 = arith.muli %0, %c1_i32_0 : i32
    %c0_i32 = arith.constant 0 : i32
    %c0_i32_1 = arith.constant 0 : i32
    return %arg0, %1, %c0_i32 : i32, i32, i32
  }
  func.func @transform_2(%arg0: i32, %arg1: i32) -> (i32, i32) {
    %c0_i32 = arith.constant 0 : i32
    %c0_i32_0 = arith.constant 0 : i32
    %c0_i32_1 = arith.constant 0 : i32
    return %c0_i32, %c0_i32_0 : i32, i32
  }
  func.func @transform_3(%arg0: i32, %arg1: i32) -> (i32, i32) {
    %c0_i32 = arith.constant 0 : i32
    %c0_i32_0 = arith.constant 0 : i32
    %c0_i32_1 = arith.constant 0 : i32
    return %c0_i32, %c0_i32_0 : i32, i32
  }
  func.func @transform_4(%arg0: i32, %arg1: i32) -> (i32, i32) {
    %c0_i32 = arith.constant 0 : i32
    %c0_i32_0 = arith.constant 0 : i32
    %c0_i32_1 = arith.constant 0 : i32
    return %c0_i32, %c0_i32_0 : i32, i32
  }
  func.func @transform_5(%arg0: i32, %arg1: i32) -> (i32, i32) {
    %c0_i32 = arith.constant 0 : i32
    %c0_i32_0 = arith.constant 0 : i32
    %c0_i32_1 = arith.constant 0 : i32
    return %c0_i32, %c0_i32_0 : i32, i32
  }
  func.func @transform_6(%arg0: i32, %arg1: i32) -> (i32, i32) {
    %c0_i32 = arith.constant 0 : i32
    %c0_i32_0 = arith.constant 0 : i32
    %c0_i32_1 = arith.constant 0 : i32
    return %c0_i32, %c0_i32_0 : i32, i32
  }
  func.func @transform_7(%arg0: i32, %arg1: i32) -> (i32, i32) {
    %c0_i32 = arith.constant 0 : i32
    %c0_i32_0 = arith.constant 0 : i32
    %c0_i32_1 = arith.constant 0 : i32
    return %c0_i32, %c0_i32_0 : i32, i32
  }
  func.func @transform_8(%arg0: i32, %arg1: i32) -> (i32, i32) {
    %c0_i32 = arith.constant 0 : i32
    %c0_i32_0 = arith.constant 0 : i32
    %c0_i32_1 = arith.constant 0 : i32
    return %c0_i32, %c0_i32_0 : i32, i32
  }
  func.func @transform_9(%arg0: i32, %arg1: i32) -> (i32, i32, i32) {
    %c0_i32 = arith.constant 0 : i32
    %c0_i32_0 = arith.constant 0 : i32
    return %arg0, %c0_i32, %arg1 : i32, i32, i32
  }
}

</mosaic_0001>

<bundles_post_ra>
// kernel: _lambda_.1
= control target key start
LH: loop header
LB: loop body
LE: loop exit
PB: predicated region body
PF: predicated region fallthrough
CT: control target
= control target key end

     0   :  { %s3720_s30 = smov 0   ;;  %s3722_s10 = smov 0   ;;  %s4370_s0 = inlined_call_operand.vmem [shape: bf16[2,384,72], index: 0, kind: input, shape index: {}, may-alias: {0,1}]   ;;  %s4371_s1 = inlined_call_operand.vmem [shape: bf16[2,384,72], index: 1, kind: input, shape index: {}, may-alias: {0,1}]   ;;  %s4372_s2 = inlined_call_operand.vmem [shape: bf16[1152,64], index: 2, kind: input, shape index: {}]   ;;  %s4373_s3 = inlined_call_operand.vmem [shape: f32[1,64], index: 3, kind: input, shape index: {}]   ;;  %s4374_s4 = inlined_call_operand.vmem [shape: bf16[64,64], index: 4, kind: input, shape index: {}]   ;;  %s4375_s5 = inlined_call_operand.vmem [shape: f32[1,64], index: 5, kind: input, shape index: {}]   ;;  %s4376_s6 = inlined_call_operand.vmem [shape: bf16[3,64], index: 6, kind: input, shape index: {}]   ;;  %s4377_s7 = inlined_call_operand.vmem [shape: f32[3,1], index: 7, kind: input, shape index: {}]   ;;  %s4378_s8 = inlined_call_operand.vmem [shape: bf16[3,128], index: 8, kind: input, shape index: {}]   ;;  %s4379_s9 = inlined_call_operand.vmem [shape: f32[2,3,256], index: 9, kind: output, shape index: {}]  }
   0x1   :  { %s3724_s11 = smov 0   ;;  %s3726_s12 = smov 0  }
   0x2   :  { %s3728_s13 = smov 0  }
   0x3 LB: > { %s28_s14 = sadd.s32 1, %s3657_s11  ;;  %s31_s15 = sadd.s32 1, %s3661_s12  ;;  %s3665_s13 = sphi %s3728_s13, %s19_s13   ;;  %s3661_s12 = sphi %s3726_s12, %s4383_s12   ;;  %s3657_s11 = sphi %s3724_s11, %s4382_s11   ;;  %s3653_s10 = sphi %s3722_s10, %s4381_s10   ;;  %s3649_s30 = sphi %s3720_s30, %s4380_s30  }
   0x4   : > { %p29_p0 = scmp.ge.s32.totalorder %s28_s14, 2  ;;  %p2789_p1 = scmp.ge.s32.totalorder %s3665_s13, 1 }
   0x5   : > { %p329_p2 = scmp.lt.s32.totalorder %s3665_s13, 5 }
   0x6   : > { %s4385_s14 = smov (%p29_p0, %s28_s14), 0  ;;  %s4387_s15 = smov (!%p29_p0, %s31_s15), %s3661_s12 }
   0x7   : > { %p330_p3 = pnand %p2789_p1, %p329_p2  ;;  %p33_p4 = scmp.ge.s32.totalorder %s4387_s15, 2 }
   0x8   : > { %v3479_v0 = vld [vmem:[%s4372_s2 + $0x40] sm:$0xff] (!%p330_p3)   ;;  %v3483_v4 = vld [vmem:[%s4372_s2 + $0x48] sm:$0xff] (!%p330_p3)   ;;  %v3487_v8 = vld [vmem:[%s4372_s2 + $0x50] sm:$0xff] (!%p330_p3)   ;;  %s3788_s24 = sshll.u32 (!%p330_p3), %s3649_s30, 4  ;;  %p383_p5 = scmp.lt.s32.totalorder (!%p330_p3), %s3653_s10, 1  ;;  %vm469_vm0 = vcmask (!%p330_p3), 588800  }
   0x9   : > { %s4389_s15 = smov (%p33_p4, %s4387_s15), 0  ;;  %333 = sbr.rel (%p330_p3) target bundleno = 894 (0x37e), region = 56 }
   0xa   : > { %v3480_v1 = vld [vmem:[%s4372_s2 + $0xc0] sm:$0xff] (!%p330_p3)   ;;  %3031 = vmatprep.subr.bf16.mxu0 (!%p330_p3), %v3479_v0  ;;  %v3484_v5 = vld [vmem:[%s4372_s2 + $0xc8] sm:$0xff] (!%p330_p3)   ;;  %v3488_v9 = vld [vmem:[%s4372_s2 + $0xd0] sm:$0xff] (!%p330_p3)   ;;  %p385_p6 = scmp.lt.s32.totalorder (!%p330_p3), %s3788_s24, 47  ;;  %s2958_s21 = sadd.s32 (!%p330_p3), 16, %s3788_s24  ;;  %vm2410_vm1 = vcmask (!%p330_p3), 523264  }
   0xb   : > { %v3481_v2 = vld [vmem:[%s4372_s2] sm:$0xff] (!%p330_p3)   ;;  %3095 = vmatprep.subr.bf16.mxu1 (!%p330_p3), %v3480_v1  ;;  %v3485_v6 = vld [vmem:[%s4372_s2 + $0x8] sm:$0xff] (!%p330_p3)   ;;  %v3489_v10 = vld [vmem:[%s4372_s2 + $0x10] sm:$0xff] (!%p330_p3)   ;;  %p396_p7 = scmp.lt.s32.totalorder (!%p330_p3), %s2958_s21, 47  ;;  %vm3668_vm2 = vmmov (!%p330_p3), 0   ;;  %p406_p8 = scmp.lt.s32.totalorder (!%p330_p3), %s3649_s30, 1 }
   0xc   : > { %v3482_v3 = vld [vmem:[%s4372_s2 + $0x80] sm:$0xff] (!%p330_p3)   ;;  %3032 = vmatpush3.bf16.msra.mxu0 (!%p330_p3), %v3481_v2  ;;  %v3486_v7 = vld [vmem:[%s4372_s2 + $0x88] sm:$0xff] (!%p330_p3)   ;;  %v3490_v11 = vld [vmem:[%s4372_s2 + $0x90] sm:$0xff] (!%p330_p3)  }
   0xd   : > { %3096 = vmatpush3.bf16.msra.mxu1 (!%p330_p3), %v3482_v3  ;;  %3033 = vmatprep.subr.bf16.mxu0 (!%p330_p3), %v3483_v4  ;;  %v3491_v12 = vld [vmem:[%s4372_s2 + $0x58] sm:$0xff] (!%p330_p3)   ;;  %v3495_v16 = vld [vmem:[%s4372_s2 + $0x60] sm:$0xff] (!%p330_p3)   ;;  %v3499_v20 = vld [vmem:[%s4372_s2 + $0x68] sm:$0xff] (!%p330_p3)  }
   0xe   : > { %3097 = vmatprep.subr.bf16.mxu1 (!%p330_p3), %v3484_v5  ;;  %v3492_v13 = vld [vmem:[%s4372_s2 + $0xd8] sm:$0xff] (!%p330_p3)   ;;  %v3496_v17 = vld [vmem:[%s4372_s2 + $0xe0] sm:$0xff] (!%p330_p3)   ;;  %v3500_v21 = vld [vmem:[%s4372_s2 + $0xe8] sm:$0xff] (!%p330_p3)  }
   0xf   : > { %v3493_v14 = vld [vmem:[%s4372_s2 + $0x18] sm:$0xff] (!%p330_p3)   ;;  %v3497_v18 = vld [vmem:[%s4372_s2 + $0x20] sm:$0xff] (!%p330_p3)   ;;  %v3501_v22 = vld [vmem:[%s4372_s2 + $0x28] sm:$0xff] (!%p330_p3)  }
  0x10   : > { %3034 = vmatpush3.bf16.msra.mxu0 %v3485_v6  ;;  %v3494_v15 = vld [vmem:[%s4372_s2 + $0x98] sm:$0xff]   ;;  %s4391_s10 = smov (!%p383_p5, %s3653_s10), 1  ;;  %v3498_v19 = vld [vmem:[%s4372_s2 + $0xa0] sm:$0xff]   ;;  %v3502_v23 = vld [vmem:[%s4372_s2 + $0xa8] sm:$0xff]   ;;  %s4393_s21 = smov (!%p396_p7, %s2958_s21), 47 }
  0x11   : > { %3098 = vmatpush3.bf16.msra.mxu1 %v3486_v7  ;;  %3035 = vmatprep.subr.bf16.mxu0 %v3487_v8  ;;  %s386_s28 = scalar_select %p385_p6, %s3788_s24, 47  ;;  %v3503_v24 = vld [vmem:[%s4372_s2 + $0x70] sm:$0xff]   ;;  %v3507_v28 = vld [vmem:[%s4372_s2 + $0x78] sm:$0xff]   ;;  %v3515_v36 = vld [vmem:[%s4372_s2 + $0x1c0] sm:$0xff]  }
  0x12   : > { %3099 = vmatprep.subr.bf16.mxu1 %v3488_v9  ;;  %s3434_s17 = smul.u32 48, %s4391_s10  ;;  %v3504_v25 = vld [vmem:[%s4372_s2 + $0xf0] sm:$0xff]   ;;  %v3508_v29 = vld [vmem:[%s4372_s2 + $0xf8] sm:$0xff]   ;;  %v3516_v37 = vld [vmem:[%s4372_s2 + $0x180] sm:$0xff]   ;;  %s4395_s30 = smov (!%p406_p8, %s3649_s30), 1 }
  0x13   : > { %v3505_v26 = vld [vmem:[%s4372_s2 + $0x30] sm:$0xff]   ;;  %v3509_v30 = vld [vmem:[%s4372_s2 + $0x38] sm:$0xff]   ;;  %v3521_v42 = vld [vmem:[%s4372_s2 + $0x1c8] sm:$0xff]   ;;  %s2794_s29 = sshll.u32 %s4391_s10, 1 }
  0x14   : > { %3036 = vmatpush3.bf16.msra.mxu0 %v3489_v10  ;;  %s388_s27 = sadd.s32 %s3434_s17, %s386_s28  ;;  %v3506_v27 = vld [vmem:[%s4372_s2 + $0xb0] sm:$0xff]   ;;  %v3510_v31 = vld [vmem:[%s4372_s2 + $0xb8] sm:$0xff]   ;;  %v3522_v43 = vld [vmem:[%s4372_s2 + $0x188] sm:$0xff]   ;;  %s399_s18 = sadd.s32 %s3434_s17, %s4393_s21 }
  0x15   : > { %3100 = vmatpush3.bf16.msra.mxu1 %v3490_v11  ;;  %3037 = vmatprep.subr.bf16.mxu0 %v3491_v12  ;;  %s2791_s22 = sshll.u32 %s388_s27, 2  ;;  %v3527_v48 = vld [vmem:[%s4372_s2 + $0x1d0] sm:$0xff]   ;;  %v3533_v53 = vld [vmem:[%s4372_s2 + $0x1d8] sm:$0xff]   ;;  %v3539_v58 = vld [vmem:[%s4372_s2 + $0x140] sm:$0xff]   ;;  %s2793_s23 = sshll.u32 %s399_s18, 2 }
  0x16   : > { %3101 = vmatprep.subr.bf16.mxu1 %v3492_v13  ;;  %s3859_s20 = scalar_lea.vmem %s4370_s0, %s2791_s22  ;;  %v3528_v49 = vld [vmem:[%s4372_s2 + $0x190] sm:$0xff]   ;;  %v3534_v54 = vld [vmem:[%s4372_s2 + $0x198] sm:$0xff]   ;;  %v3540_v59 = vld [vmem:[%s4372_s2 + $0x1e0] sm:$0xff]   ;;  %s3947_s16 = scalar_lea.vmem %s4371_s1, %s2793_s23 }
  0x17   : > { %v3511_v32 = vld [vmem:[%s3859_s20 + $0x8] sm:$0xff]   ;;  %v3512_v33 = vld [vmem:[%s3859_s20 + $0x18] sm:$0xff]   ;;  %v3513_v34 = vld [vmem:[%s3859_s20] sm:$0xff]   ;;  %s409_s18 = sadd.s32 %s2794_s29, %s4395_s30 }
  0x18   : > { %3038 = vmatpush3.bf16.msra.mxu0 %v3493_v14  ;;  %2959 = vmatprep.mubr.msk.bf16.mxu0 %vm469_vm0, %v3511_v32  ;;  %v3514_v35 = vld [vmem:[%s3859_s20 + $0x10] sm:$0xff]   ;;  %v3518_v39 = vld [vmem:[%s3859_s20 + $0x20] sm:$0xff]   ;;  %v3519_v40 = vld [vmem:[%s3859_s20 + $0x8] sm:$0xff]  }
  0x19   : > { %3102 = vmatpush3.bf16.msra.mxu1 %v3494_v15  ;;  %3039 = vmatprep.subr.bf16.mxu0 %v3495_v16  ;;  %v3517_v38 = vld [vmem:[%s3859_s20 + $0x10] sm:$0xff]   ;;  %v3520_v41 = vld [vmem:[%s3859_s20 + $0x18] sm:$0xff]   ;;  %v3524_v45 = vld [vmem:[%s3859_s20 + $0x28] sm:$0xff]  }
  0x1a   : > { %3103 = vmatprep.subr.bf16.mxu1 %v3496_v17  ;;  %2975 = vmatprep.mubr.msk.bf16.mxu1 %vm469_vm0, %v3512_v33  ;;  %v3523_v44 = vld [vmem:[%s3859_s20 + $0x18] sm:$0xff]   ;;  %v3525_v46 = vld [vmem:[%s3859_s20 + $0x10] sm:$0xff]   ;;  %v3526_v47 = vld [vmem:[%s3859_s20 + $0x20] sm:$0xff]  }
  0x1b   : > { %v3529_v50 = vld [vmem:[%s3859_s20 + $0x20] sm:$0xff]   ;;  %v3530_v51 = vld [vmem:[%s3859_s20 + $0x30] sm:$0xff]   ;;  %v3531_v52 = vld [vmem:[%s3859_s20 + $0x18] sm:$0xff]  }
  0x1c   : > { %3040 = vmatpush3.bf16.msra.mxu0 %v3497_v18  ;;  %v3532_v55 = vld [vmem:[%s3859_s20 + $0x28] sm:$0xff]   ;;  %v3536_v57 = vld [vmem:[%s3859_s20 + $0x38] sm:$0xff]   ;;  %v3537_v60 = vld [vmem:[%s3859_s20 + $0x20] sm:$0xff]  }
  0x1d   : > { %3104 = vmatpush3.bf16.msra.mxu1 %v3498_v19  ;;  %3041 = vmatprep.subr.bf16.mxu0 %v3499_v20  ;;  %v3535_v56 = vld [vmem:[%s3859_s20 + $0x28] sm:$0xff]   ;;  %v3541_v61 = vld [vmem:[%s4372_s2 + $0x100] sm:$0xff]   ;;  %v3538_v62 = vld [vmem:[%s3859_s20 + $0x30] sm:$0xff]  }
  0x1e   : > { %3105 = vmatprep.subr.bf16.mxu1 %v3500_v21  ;;  %v3542_v63 = vld [vmem:[%s4372_s2 + $0x1a0] sm:$0xff]   ;;  %v3543_v0 = vld [vmem:[%s4372_s2 + $0x148] sm:$0xff]   ;;  %v3545_v2 = vld [vmem:[%s3859_s20 + $0x30] sm:$0xff]  }
  0x1f   : > { %v3544_v1 = vld [vmem:[%s4372_s2 + $0x108] sm:$0xff]   ;;  %v3546_v3 = vld [vmem:[%s3947_s16] sm:$0xff]   ;;  %v3549_v5 = vld [vmem:[%s4372_s2 + $0x150] sm:$0xff]  }
  0x20   : > { %3042 = vmatpush3.bf16.msra.mxu0 %v3501_v22  ;;  %v3547_v4 = vld [vmem:[%s3859_s20 + $0x28] sm:$0xff]   ;;  %v3548_v6 = vld [vmem:[%s3859_s20 + $0x38] sm:$0xff]   ;;  %v3551_v8 = vld [vmem:[%s4372_s2 + $0x110] sm:$0xff]  }
  0x21   : > { %3106 = vmatpush3.bf16.msra.mxu1 %v3502_v23  ;;  %3043 = vmatprep.subr.bf16.mxu0 %v3503_v24  ;;  %v3550_v7 = vld [vmem:[%s4372_s2 + $0x1e8] sm:$0xff]   ;;  %v3553_v10 = vld [vmem:[%s4372_s2 + $0x158] sm:$0xff]   ;;  %v3557_v14 = vld [vmem:[%s3859_s20 + $0x30] sm:$0xff]  }
  0x22   : > { %3107 = vmatprep.subr.bf16.mxu1 %v3504_v25  ;;  %v3552_v9 = vld [vmem:[%s4372_s2 + $0x1a8] sm:$0xff]   ;;  %v3554_v11 = vld [vmem:[%s4372_s2 + $0x118] sm:$0xff]   ;;  %v3558_v15 = vld [vmem:[%s3947_s16] sm:$0xff]  }
  0x23   : > { %v3555_v12 = vld [vmem:[%s3859_s20 + $0x38] sm:$0xff]   ;;  %v3556_v13 = vld [vmem:[%s3947_s16 + $0x8] sm:$0xff]   ;;  %v3559_v16 = vld [vmem:[%s4372_s2 + $0x160] sm:$0xff]  }
  0x24   : > { %3044 = vmatpush3.bf16.msra.mxu0 %v3505_v26  ;;  %v3560_v17 = vld [vmem:[%s4372_s2 + $0x1f0] sm:$0xff]   ;;  %v3561_v18 = vld [vmem:[%s4372_s2 + $0x120] sm:$0xff]   ;;  %v3563_v20 = vld [vmem:[%s4372_s2 + $0x168] sm:$0xff]  }
  0x25   : > { %3108 = vmatpush3.bf16.msra.mxu1 %v3506_v27  ;;  %3045 = vmatprep.subr.bf16.mxu0 %v3507_v28  ;;  %v3562_v19 = vld [vmem:[%s4372_s2 + $0x1b0] sm:$0xff]   ;;  %v3564_v21 = vld [vmem:[%s4372_s2 + $0x128] sm:$0xff]   ;;  %v3565_v22 = vld [vmem:[%s3947_s16] sm:$0xff]  }
  0x26   : > { %3109 = vmatprep.subr.bf16.mxu1 %v3508_v29  ;;  %v3566_v23 = vld [vmem:[%s3947_s16 + $0x10] sm:$0xff]   ;;  %v3567_v24 = vld [vmem:[%s3859_s20 + $0x38] sm:$0xff]   ;;  %v3568_v25 = vld [vmem:[%s3947_s16 + $0x8] sm:$0xff]  }
  0x27   : > { %v3569_v26 = vld [vmem:[%s4372_s2 + $0x170] sm:$0xff]   ;;  %v3570_v27 = vld [vmem:[%s4372_s2 + $0x1f8] sm:$0xff]   ;;  %v3575_v32 = vld [vmem:[%s3859_s20 + $0x28] sm:$0xff]  }
  0x28   : > { %3046 = vmatpush3.bf16.msra.mxu0 %v3509_v30  ;;  %v3571_v28 = vld [vmem:[%s4372_s2 + $0x130] sm:$0xff]   ;;  %v3572_v29 = vld [vmem:[%s4372_s2 + $0x1b8] sm:$0xff]  }
  0x29   : > { %3110 = vmatpush3.bf16.msra.mxu1 %v3510_v31  ;;  %3159 = vmatprep.subr.bf16.mxu0 %v3539_v58  ;;  %v3573_v30 = vld [vmem:[%s4372_s2 + $0x178] sm:$0xff]   ;;  %v3600_v58 = vld [vmem:[%s3947_s16 + $0x10] sm:$0xff]  }
  0x2a   : > { %3223 = vmatprep.subr.bf16.mxu1 %v3515_v36  ;;  %v3574_v31 = vld [vmem:[%s4372_s2 + $0x138] sm:$0xff]   ;;  %v3579_v36 = vld [vmem:[%s4372_s2 + $0x200] sm:$0xff]  }
  0x2b   : > { %2960 = vmatmul.mubr.msk.bf16.vlgmr.msra.gmra.mrb[0].mxu0 %vm469_vm0, %v3513_v34  ;;  %v3576_v33 = vld [vmem:[%s3859_s20 + $0x38] sm:$0xff]   ;;  %v4039_v34 = vld [vmem:[%s3859_s20 + $0x20] sm:$0xff]  }
  0x2c   : > { %2976 = vmatmul.mubr.msk.bf16.vlgmr.msra.gmra.mrb[0].mxu1 %vm469_vm0, %v3514_v35  ;;  %2961 = vmatprep.mubr.msk.bf16.mxu0 %vm469_vm0, %v3517_v38  ;;  %v3578_v35 = vld [vmem:[%s3859_s20 + $0x30] sm:$0xff]   ;;  %v3581_v38 = vld [vmem:[%s3947_s16] sm:$0xff]  }
  0x2d   : > { %3224 = vmatpush3.bf16.msra.mxu1 %v3516_v37  ;;  %2977 = vmatprep.mubr.msk.bf16.mxu1 %vm469_vm0, %v3518_v39  ;;  %v3580_v37 = vld [vmem:[%s3859_s20 + $0x30] sm:$0xff]   ;;  %v4053_v39 = vld [vmem:[%s3859_s20 + $0x28] sm:$0xff]  }
  0x2e   : > { %3225 = vmatprep.subr.bf16.mxu1 %v3521_v42  ;;  %3160 = vmatpush3.bf16.msra.mxu0 %v3541_v61  ;;  %v3585_v42 = vld [vmem:[%s3859_s20 + $0x38] sm:$0xff]   ;;  %v4116_v61 = vld [vmem:[%s3947_s16 + $0x8] sm:$0xff]  }
  0x2f   : > { %3161 = vmatprep.subr.bf16.mxu0 %v3543_v0  ;;  %v3605_v0 = vld [vmem:[%s3947_s16 + $0x18] sm:$0xff]  }
  0x31   : > { %3226 = vmatpush3.bf16.msra.mxu1 %v3522_v43  ;;  %v3586_v43 = vld [vmem:[%s3947_s16 + $0x8] sm:$0xff]  }
  0x32   : > { %3227 = vmatprep.subr.bf16.mxu1 %v3527_v48  ;;  %3162 = vmatpush3.bf16.msra.mxu0 %v3544_v1  ;;  %v3591_v48 = vld [vmem:[%s3947_s16 + $0x10] sm:$0xff]   ;;  %v3606_v1 = vld [vmem:[%s3947_s16 + $0x28] sm:$0xff]  }
  0x33   : > { %2962 = vmatmul.mubr.msk.bf16.gmra.mrb[4].mxu0 %vm469_vm0, %v3519_v40  ;;  %3163 = vmatprep.subr.bf16.mxu0 %v3549_v5  ;;  %v3583_v40 = vld [vmem:[%s3859_s20 + $0x38] sm:$0xff]   ;;  %v3611_v5 = vld [vmem:[%s3947_s16 + $0x30] sm:$0xff]  }
  0x34   : > { %2978 = vmatmul.mubr.msk.bf16.gmra.mrb[4].mxu1 %vm469_vm0, %v3520_v41  ;;  %2963 = vmatprep.mubr.msk.bf16.mxu0 %vm469_vm0, %v3523_v44  ;;  %v3584_v41 = vld [vmem:[%s4372_s2 + $0x208] sm:$0xff]   ;;  %v3589_v44 = vld [vmem:[%s4372_s2 + $0x210] sm:$0xff]  }
  0x35   : > { %2979 = vmatprep.mubr.msk.bf16.mxu1 %vm469_vm0, %v3524_v45  ;;  %3228 = vmatpush3.bf16.msra.mxu1 %v3528_v49  ;;  %v4071_v45 = vld [vmem:[%s3859_s20 + $0x30] sm:$0xff]   ;;  %v3594_v49 = vld [vmem:[%s4372_s2 + $0x218] sm:$0xff]  }
  0x36   : > { %3229 = vmatprep.subr.bf16.mxu1 %v3533_v53  ;;  %3164 = vmatpush3.bf16.msra.mxu0 %v3551_v8  ;;  %v3595_v53 = vld [vmem:[%s3947_s16 + $0x8] sm:$0xff]   ;;  %v3615_v8 = vld [vmem:[%s3947_s16] sm:$0xff]  }
  0x37   : > { %3165 = vmatprep.subr.bf16.mxu0 %v3553_v10  ;;  %v3617_v10 = vld [vmem:[%s3947_s16 + $0x10] sm:$0xff]  }
  0x39   : > { %3230 = vmatpush3.bf16.msra.mxu1 %v3534_v54  ;;  %v3596_v54 = vld [vmem:[%s3947_s16 + $0x18] sm:$0xff]  }
  0x3a   : > { %3231 = vmatprep.subr.bf16.mxu1 %v3540_v59  ;;  %3166 = vmatpush3.bf16.msra.mxu0 %v3554_v11  ;;  %v3601_v59 = vld [vmem:[%s3947_s16 + $0x20] sm:$0xff]   ;;  %v3618_v11 = vld [vmem:[%s3947_s16 + $0x18] sm:$0xff]  }
  0x3b   : > { %2964 = vmatmul.mubr.msk.bf16.gmra.mrb[8].mxu0 %vm469_vm0, %v3525_v46  ;;  %3167 = vmatprep.subr.bf16.mxu0 %v3559_v16  ;;  %v3588_v46 = vld [vmem:[%s3947_s16] sm:$0xff]  }
  0x3c   : > { %2980 = vmatmul.mubr.msk.bf16.gmra.mrb[8].mxu1 %vm469_vm0, %v3526_v47  ;;  %2965 = vmatprep.mubr.msk.bf16.mxu0 %vm469_vm0, %v3529_v50  ;;  %v3590_v47 = vld [vmem:[%s3947_s16] sm:$0xff]   ;;  %v4085_v50 = vld [vmem:[%s3859_s20 + $0x38] sm:$0xff]  }
  0x3d   : > { %2981 = vmatprep.mubr.msk.bf16.mxu1 %vm469_vm0, %v3530_v51  ;;  %3232 = vmatpush3.bf16.msra.mxu1 %v3542_v63  ;;  %v3593_v51 = vld [vmem:[%s3947_s16 + $0x8] sm:$0xff]   ;;  %v3603_v63 = vld [vmem:[%s3947_s16 + $0x18] sm:$0xff]   ;;  %v3623_v16 = vld [vmem:[%s4374_s4] sm:$0xff]  }
  0x3e   : > { %3233 = vmatprep.subr.bf16.mxu1 %v3550_v7  ;;  %3168 = vmatpush3.bf16.msra.mxu0 %v3561_v18  ;;  %v3613_v7 = vld [vmem:[%s3947_s16 + $0x28] sm:$0xff]   ;;  %v3625_v18 = vld [vmem:[%s4374_s4 + $0x10] sm:$0xff]  }
  0x3f   : > { %3169 = vmatprep.subr.bf16.mxu0 %v3563_v20 }
  0x41   : > { %3234 = vmatpush3.bf16.msra.mxu1 %v3552_v9  ;;  %v3616_v9 = vld [vmem:[%s3947_s16 + $0x8] sm:$0xff]  }
  0x42   : > { %3235 = vmatprep.subr.bf16.mxu1 %v3560_v17  ;;  %3170 = vmatpush3.bf16.msra.mxu0 %v3564_v21  ;;  %v3624_v17 = vld [vmem:[%s4374_s4 + $0x8] sm:$0xff]   ;;  %v4175_v21 = vld [vmem:[%s4373_s3] ss:$0 sm:$0xff] }
  0x43   : > { %2966 = vmatmul.mubr.msk.bf16.gmra.mrb[12].mxu0 %vm469_vm0, %v3531_v52  ;;  %3171 = vmatprep.subr.bf16.mxu0 %v3569_v26  ;;  %v3599_v52 = vld [vmem:[%s4372_s2 + $0x220] sm:$0xff]  }
  0x44   : > { %2982 = vmatmul.mubr.msk.bf16.gmra.mrb[12].mxu1 %vm469_vm0, %v3532_v55  ;;  %2967 = vmatprep.mubr.msk.bf16.mxu0 %vm469_vm0, %v3535_v56  ;;  %v3604_v55 = vld [vmem:[%s4372_s2 + $0x228] sm:$0xff]   ;;  %v4102_v56 = vld [vmem:[%s3947_s16] sm:$0xff]  }
  0x45   : > { %2983 = vmatprep.mubr.msk.bf16.mxu1 %vm469_vm0, %v3536_v57  ;;  %3236 = vmatpush3.bf16.msra.mxu1 %v3562_v19  ;;  %v3598_v57 = vld [vmem:[%s3947_s16 + $0x10] sm:$0xff]  }
  0x46   : > { %3237 = vmatprep.subr.bf16.mxu1 %v3570_v27  ;;  %3172 = vmatpush3.bf16.msra.mxu0 %v3571_v28 }
  0x47   : > { %3173 = vmatprep.subr.bf16.mxu0 %v3573_v30 }
  0x49   : > { %3238 = vmatpush3.bf16.msra.mxu1 %v3572_v29 }
  0x4a   : > { %3174 = vmatpush3.bf16.msra.mxu0 %v3574_v31  ;;  %3333 = vmatprep.subr.bf16.mxu1 %v3579_v36 }
  0x4b   : > { %2968 = vmatmul.mubr.msk.bf16.gmra.mrb[16].mxu0 %vm469_vm0, %v3537_v60  ;;  %v3609_v60 = vld [vmem:[%s4372_s2 + $0x230] sm:$0xff]  }
  0x4c   : > { %2984 = vmatmul.mubr.msk.bf16.gmra.mrb[16].mxu1 %vm469_vm0, %v3538_v62  ;;  %2969 = vmatprep.mubr.msk.bf16.mxu0 %vm469_vm0, %v3545_v2  ;;  %v3614_v62 = vld [vmem:[%s4372_s2 + $0x238] sm:$0xff]   ;;  %v4130_v2 = vld [vmem:[%s3947_s16 + $0x10] sm:$0xff]  }
  0x4d   : > { %2985 = vmatprep.mubr.msk.bf16.mxu1 %vm469_vm0, %v3546_v3  ;;  %v3608_v3 = vld [vmem:[%s3947_s16 + $0x20] sm:$0xff]  }
  0x53   : > { %2970 = vmatmul.mubr.msk.bf16.gmra.mrb[20].mxu0 %vm469_vm0, %v3547_v4  ;;  %v3610_v4 = vld [vmem:[%s3947_s16 + $0x20] sm:$0xff]  }
  0x54   : > { %2986 = vmatmul.mubr.msk.bf16.gmra.mrb[20].mxu1 %vm469_vm0, %v3548_v6  ;;  %2971 = vmatprep.mubr.msk.bf16.mxu0 %vm469_vm0, %v3555_v12  ;;  %v4141_v6 = vld [vmem:[%s3947_s16 + $0x18] sm:$0xff]   ;;  %v3619_v12 = vld [vmem:[%s3947_s16 + $0x20] sm:$0xff]  }
  0x55   : > { %2987 = vmatprep.mubr.msk.bf16.mxu1 %vm469_vm0, %v3556_v13  ;;  %v3620_v13 = vld [vmem:[%s3947_s16 + $0x28] sm:$0xff]  }
  0x5b   : > { %2972 = vmatmul.mubr.msk.bf16.gmra.mrb[24].mxu0 %vm469_vm0, %v3557_v14  ;;  %v3621_v14 = vld [vmem:[%s3947_s16 + $0x30] sm:$0xff]  }
  0x5c   : > { %2988 = vmatmul.mubr.msk.bf16.gmra.mrb[24].mxu1 %vm469_vm0, %v3558_v15  ;;  %2973 = vmatprep.mubr.msk.bf16.mxu0 %vm469_vm0, %v3565_v22  ;;  %v3622_v15 = vld [vmem:[%s3947_s16 + $0x38] sm:$0xff]   ;;  %s2795_s16 = sshll.u32 %s409_s18, 2 }
  0x5d   : > { %2989 = vmatprep.mubr.msk.bf16.mxu1 %vm469_vm0, %v3566_v23  ;;  %s411_s27 = scalar_lea.vmem %s4379_s9, %s2795_s16 }
  0x63   : > { %2974 = vmatmul.mubr.msk.bf16.gmra.mrb[28].mxu0 %vm469_vm0, %v3567_v24 }
  0x64   : > { %2990 = vmatmul.mubr.msk.bf16.gmra.mrb[28].mxu1 %vm469_vm0, %v3568_v25  ;;  %2991 = vmatprep.mubr.msk.bf16.mxu0 %vm469_vm0, %v3575_v32 }
  0x65   : > { %3007 = vmatprep.mubr.msk.bf16.mxu1 %vm469_vm0, %v3576_v33 }
  0x6b   : > { %2992 = vmatmul.mubr.msk.bf16.vlgmr.msra.gmra.mrb[32].mxu0 %vm469_vm0, %v4039_v34 }
  0x6c   : > { %3008 = vmatmul.mubr.msk.bf16.vlgmr.msra.gmra.mrb[32].mxu1 %vm469_vm0, %v3578_v35  ;;  %2993 = vmatprep.mubr.msk.bf16.mxu0 %vm469_vm0, %v3580_v37 }
  0x6d   : > { %3334 = vmatpush3.bf16.msra.mxu1 %v3579_v36  ;;  %3009 = vmatprep.mubr.msk.bf16.mxu1 %vm469_vm0, %v3581_v38  ;;  %v3626_v36 = vld [vmem:[%s4374_s4 + $0x18] sm:$0xff]  }
  0x6e   : > { %3335 = vmatprep.subr.bf16.mxu1 %v3584_v41 }
  0x71   : > { %3336 = vmatpush3.bf16.msra.mxu1 %v3584_v41 }
  0x72   : > { %3337 = vmatprep.subr.bf16.mxu1 %v3589_v44 }
  0x73   : > { %2994 = vmatmul.mubr.msk.bf16.gmra.mrb[36].mxu0 %vm469_vm0, %v4053_v39 }
  0x74   : > { %3010 = vmatmul.mubr.msk.bf16.gmra.mrb[36].mxu1 %vm469_vm0, %v3583_v40  ;;  %2995 = vmatprep.mubr.msk.bf16.mxu0 %vm469_vm0, %v3585_v42 }
  0x75   : > { %3011 = vmatprep.mubr.msk.bf16.mxu1 %vm469_vm0, %v3586_v43  ;;  %3338 = vmatpush3.bf16.msra.mxu1 %v3589_v44 }
  0x76   : > { %3339 = vmatprep.subr.bf16.mxu1 %v3594_v49 }
  0x79   : > { %3340 = vmatpush3.bf16.msra.mxu1 %v3594_v49 }
  0x7a   : > { %3341 = vmatprep.subr.bf16.mxu1 %v3599_v52 }
  0x7b   : > { %2996 = vmatmul.mubr.msk.bf16.gmra.mrb[40].mxu0 %vm469_vm0, %v4071_v45 }
  0x7c   : > { %3012 = vmatmul.mubr.msk.bf16.gmra.mrb[40].mxu1 %vm469_vm0, %v3588_v46  ;;  %2997 = vmatprep.mubr.msk.bf16.mxu0 %vm469_vm0, %v3590_v47 }
  0x7d   : > { %3013 = vmatprep.mubr.msk.bf16.mxu1 %vm469_vm0, %v3591_v48  ;;  %3342 = vmatpush3.bf16.msra.mxu1 %v3599_v52 }
  0x7e   : > { %3343 = vmatprep.subr.bf16.mxu1 %v3604_v55 }
  0x81   : > { %3344 = vmatpush3.bf16.msra.mxu1 %v3604_v55 }
  0x82   : > { %3345 = vmatprep.subr.bf16.mxu1 %v3609_v60 }
  0x83   : > { %2998 = vmatmul.mubr.msk.bf16.gmra.mrb[44].mxu0 %vm469_vm0, %v4085_v50 }
  0x84   : > { %3014 = vmatmul.mubr.msk.bf16.gmra.mrb[44].mxu1 %vm469_vm0, %v3593_v51  ;;  %2999 = vmatprep.mubr.msk.bf16.mxu0 %vm469_vm0, %v3595_v53 }
  0x85   : > { %3015 = vmatprep.mubr.msk.bf16.mxu1 %vm469_vm0, %v3596_v54  ;;  %3346 = vmatpush3.bf16.msra.mxu1 %v3609_v60 }
  0x86   : > { %3347 = vmatprep.subr.bf16.mxu1 %v3614_v62 }
  0x89   : > { %3348 = vmatpush3.bf16.msra.mxu1 %v3614_v62 }
  0x8a   : > { %3365 = vmatprep.subr.bf16.mxu1 %v3623_v16 }
  0x8b   : > { %3000 = vmatmul.mubr.msk.bf16.gmra.mrb[48].mxu0 %vm469_vm0, %v4102_v56 }
  0x8c   : > { %3016 = vmatmul.mubr.msk.bf16.gmra.mrb[48].mxu1 %vm469_vm0, %v3598_v57  ;;  %3001 = vmatprep.mubr.msk.bf16.mxu0 %vm469_vm0, %v3600_v58 }
  0x8d   : > { %3017 = vmatprep.mubr.msk.bf16.mxu1 %vm469_vm0, %v3601_v59 }
  0x93   : > { %3002 = vmatmul.mubr.msk.bf16.gmra.mrb[52].mxu0 %vm469_vm0, %v4116_v61 }
  0x94   : > { %3018 = vmatmul.mubr.msk.bf16.gmra.mrb[52].mxu1 %vm469_vm0, %v3603_v63  ;;  %3003 = vmatprep.mubr.msk.bf16.mxu0 %vm469_vm0, %v3605_v0 }
  0x95   : > { %3019 = vmatprep.mubr.msk.bf16.mxu1 %vm469_vm0, %v3606_v1 }
  0x9b   : > { %3004 = vmatmul.mubr.msk.bf16.gmra.mrb[56].mxu0 %vm469_vm0, %v4130_v2 }
  0x9c   : > { %3020 = vmatmul.mubr.msk.bf16.gmra.mrb[56].mxu1 %vm469_vm0, %v3608_v3  ;;  %3005 = vmatprep.mubr.msk.bf16.mxu0 %vm469_vm0, %v3610_v4 }
  0x9d   : > { %3021 = vmatprep.mubr.msk.bf16.mxu1 %vm469_vm0, %v3611_v5 }
  0xa3   : > { %3006 = vmatmul.mubr.msk.bf16.gmra.mrb[60].mxu0 %vm469_vm0, %v4141_v6 }
  0xa4   : > { %3022 = vmatmul.mubr.msk.bf16.gmra.mrb[60].mxu1 %vm469_vm0, %v3613_v7 }
  0xa5   : > { %3349 = vmatprep.mubr.msk.bf16.mxu1 %vm469_vm0, %v3615_v8 }
  0xac   : > { %3350 = vmatmul.mubr.msk.bf16.vlgmr.msra.gmra.mrb[64].mxu1 %vm469_vm0, %v3616_v9 }
  0xad   : > { %3353 = vmatprep.mubr.msk.bf16.mxu1 %vm469_vm0, %v3617_v10  ;;  %3366 = vmatpush3.bf16.msra.mxu1 %v3623_v16 }
  0xae   : > { %3367 = vmatprep.subr.bf16.mxu1 %v3624_v17 }
  0xb1   : > { %3368 = vmatpush3.bf16.msra.mxu1 %v3624_v17 }
  0xb2   : > { %3369 = vmatprep.subr.bf16.mxu1 %v3625_v18 }
  0xb4   : > { %3354 = vmatmul.mubr.msk.bf16.gmra.mrb[68].mxu1 %vm469_vm0, %v3618_v11 }
  0xb5   : > { %3357 = vmatprep.mubr.msk.bf16.mxu1 %vm469_vm0, %v3619_v12  ;;  %3370 = vmatpush3.bf16.msra.mxu1 %v3625_v18 }
  0xb6   : > { %3371 = vmatprep.subr.bf16.mxu1 %v3626_v36 }
  0xb9   : > { %3372 = vmatpush3.bf16.msra.mxu1 %v3626_v36 }
  0xbc   : > { %3358 = vmatmul.mubr.msk.bf16.gmra.mrb[72].mxu1 %vm469_vm0, %v3620_v13 }
  0xbd   : > { %3361 = vmatprep.mubr.msk.bf16.mxu1 %vm469_vm0, %v3621_v14 }
  0xc4   : > { %3362 = vmatmul.mubr.msk.bf16.gmra.mrb[76].mxu1 %vm469_vm0, %v3622_v15 }
  0xfe   : > { %v3047_v19 = vpop.f32.mrb[0].mxu0 }
  0xff   : > { %v3111_v20 = vpop.f32.mrb[0].mxu1  ;;  %v3048_v22 = vpop.f32.mrb[1].mxu0 }
 0x100   : > { %v3049_v23 = vadd.f32 %v3048_v22, %v3047_v19  ;;  %v3112_v24 = vpop.f32.mrb[1].mxu1  ;;  %v3050_v25 = vpop.f32.mrb[2].mxu0 }
 0x101   : > { %v3113_v26 = vadd.f32 %v3112_v24, %v3111_v20  ;;  %v3114_v27 = vpop.f32.mrb[2].mxu1  ;;  %v3051_v28 = vpop.f32.mrb[3].mxu0 }
 0x102   : > { %v1897_v29 = vadd.f32 %v3049_v23, %v4175_v21  ;;  %v3052_v30 = vadd.f32 %v3051_v28, %v3050_v25  ;;  %v3115_v31 = vpop.f32.mrb[3].mxu1 }
 0x103   : > { %v3116_v32 = vadd.f32 %v3115_v31, %v3114_v27 }
 0x104   : > { %v4178_v33 = vadd.f32 %v3113_v26, %v1897_v29  ;;  %v1900_v35 = vadd.f32 %v3052_v30, %v4175_v21 }
 0x106   : > { %v4184_v37 = vadd.f32 %v3116_v32, %v1900_v35  ;;  %v3053_v38 = vpop.f32.mrb[4].mxu0 }
 0x107   : > { %v3117_v40 = vpop.f32.mrb[4].mxu1  ;;  %v3054_v41 = vpop.f32.mrb[5].mxu0 }
 0x108   : > { %v3055_v42 = vadd.f32 %v3054_v41, %v3053_v38  ;;  %v3118_v43 = vpop.f32.mrb[5].mxu1  ;;  %v3056_v44 = vpop.f32.mrb[6].mxu0 }
 0x109   : > { %v3119_v46 = vadd.f32 %v3118_v43, %v3117_v40  ;;  %v3120_v47 = vpop.f32.mrb[6].mxu1  ;;  %v3057_v48 = vpop.f32.mrb[7].mxu0 }
 0x10a   : > { %v1905_v49 = vadd.f32 %v3055_v42, %v4175_v21  ;;  %v3058_v51 = vadd.f32 %v3057_v48, %v3056_v44  ;;  %v3121_v52 = vpop.f32.mrb[7].mxu1 }
 0x10b   : > { %v3122_v53 = vadd.f32 %v3121_v52, %v3120_v47  ;;  %v796_v47 = vsel %vm469_vm0, %v4039_v34, 0 }
 0x10c   : > { %v4187_v54 = vadd.f32 %v3119_v46, %v1905_v49  ;;  %v1908_v55 = vadd.f32 %v3058_v51, %v4175_v21  ;;  %v3667_v49 = vmov 0.0  }
 0x10d   : > { %3389 = vmatprep.subr.bf16.mxu0 %v3667_v49  ;;  %3405 = vmatprep.mubr.msk.bf16.mxu0 %vm3668_vm2, %v3667_v49 }
 0x10e   : > { %v4190_v57 = vadd.f32 %v3122_v53, %v1908_v55  ;;  %v3059_v58 = vpop.f32.mrb[8].mxu0  ;;  %3390 = vmatpush3.bf16.xpose.msra.mxu0 %v796_v47 }
 0x10f   : > { %v3123_v59 = vpop.f32.mrb[8].mxu1  ;;  %v3060_v60 = vpop.f32.mrb[9].mxu0  ;;  %3391 = vmatprep.subr.bf16.mxu0 %v3667_v49 }
 0x110   : > { %v3061_v62 = vadd.f32 %v3060_v60, %v3059_v58  ;;  %v3124_v63 = vpop.f32.mrb[9].mxu1  ;;  %v3062_v0 = vpop.f32.mrb[10].mxu0 }
 0x111   : > { %v3125_v1 = vadd.f32 %v3124_v63, %v3123_v59  ;;  %v3126_v3 = vpop.f32.mrb[10].mxu1  ;;  %v3063_v4 = vpop.f32.mrb[11].mxu0 }
 0x112   : > { %v1913_v5 = vadd.f32 %v3061_v62, %v4175_v21  ;;  %v3064_v7 = vadd.f32 %v3063_v4, %v3062_v0  ;;  %v3127_v8 = vpop.f32.mrb[11].mxu1 }
 0x113   : > { %v3128_v9 = vadd.f32 %v3127_v8, %v3126_v3  ;;  %v799_v3 = vsel %vm469_vm0, %v4053_v39, 0 }
 0x114   : > { %v4193_v10 = vadd.f32 %v3125_v1, %v1913_v5  ;;  %v1916_v11 = vadd.f32 %v3064_v7, %v4175_v21 }
 0x116   : > { %v4196_v12 = vadd.f32 %v3128_v9, %v1916_v11  ;;  %v3065_v13 = vpop.f32.mrb[12].mxu0  ;;  %3392 = vmatpush3.bf16.xpose.msra.mxu0 %v799_v3 }
 0x117   : > { %v3129_v14 = vpop.f32.mrb[12].mxu1  ;;  %v3066_v15 = vpop.f32.mrb[13].mxu0  ;;  %3393 = vmatprep.subr.bf16.mxu0 %v3667_v49 }
 0x118   : > { %v3067_v16 = vadd.f32 %v3066_v15, %v3065_v13  ;;  %v3130_v17 = vpop.f32.mrb[13].mxu1  ;;  %v3068_v18 = vpop.f32.mrb[14].mxu0 }
 0x119   : > { %v3131_v19 = vadd.f32 %v3130_v17, %v3129_v14  ;;  %v3132_v20 = vpop.f32.mrb[14].mxu1  ;;  %v3069_v22 = vpop.f32.mrb[15].mxu0 }
 0x11a   : > { %v1921_v23 = vadd.f32 %v3067_v16, %v4175_v21  ;;  %v3070_v24 = vadd.f32 %v3069_v22, %v3068_v18  ;;  %v3133_v25 = vpop.f32.mrb[15].mxu1 }
 0x11b   : > { %v3134_v26 = vadd.f32 %v3133_v25, %v3132_v20 }
 0x11c   : > { %v4199_v27 = vadd.f32 %v3131_v19, %v1921_v23  ;;  %v1924_v28 = vadd.f32 %v3070_v24, %v4175_v21  ;;  %v802_v23 = vsel %vm469_vm0, %v4071_v45, 0 }
 0x11e   : > { %v4202_v29 = vadd.f32 %v3134_v26, %v1924_v28  ;;  %v3071_v30 = vpop.f32.mrb[16].mxu0  ;;  %3394 = vmatpush3.bf16.xpose.msra.mxu0 %v802_v23 }
 0x11f   : > { %v3135_v31 = vpop.f32.mrb[16].mxu1  ;;  %v3072_v32 = vpop.f32.mrb[17].mxu0  ;;  %3395 = vmatprep.subr.bf16.mxu0 %v3667_v49 }
 0x120   : > { %v3073_v35 = vadd.f32 %v3072_v32, %v3071_v30  ;;  %v3136_v36 = vpop.f32.mrb[17].mxu1  ;;  %v3074_v38 = vpop.f32.mrb[18].mxu0 }
 0x121   : > { %v3137_v40 = vadd.f32 %v3136_v36, %v3135_v31  ;;  %v3138_v41 = vpop.f32.mrb[18].mxu1  ;;  %v3075_v42 = vpop.f32.mrb[19].mxu0 }
 0x122   : > { %v1929_v43 = vadd.f32 %v3073_v35, %v4175_v21  ;;  %v3076_v44 = vadd.f32 %v3075_v42, %v3074_v38  ;;  %v3139_v46 = vpop.f32.mrb[19].mxu1 }
 0x123   : > { %v3140_v48 = vadd.f32 %v3139_v46, %v3138_v41  ;;  %v805_v46 = vsel %vm469_vm0, %v4085_v50, 0 }
 0x124   : > { %v4208_v51 = vadd.f32 %v3137_v40, %v1929_v43  ;;  %v1932_v52 = vadd.f32 %v3076_v44, %v4175_v21 }
 0x126   : > { %v4212_v53 = vadd.f32 %v3140_v48, %v1932_v52  ;;  %v3077_v55 = vpop.f32.mrb[20].mxu0  ;;  %3396 = vmatpush3.bf16.xpose.msra.mxu0 %v805_v46 }
 0x127   : > { %v3141_v58 = vpop.f32.mrb[20].mxu1  ;;  %v3078_v59 = vpop.f32.mrb[21].mxu0  ;;  %3397 = vmatprep.subr.bf16.mxu0 %v3667_v49 }
 0x128   : > { %v3079_v60 = vadd.f32 %v3078_v59, %v3077_v55  ;;  %v3142_v62 = vpop.f32.mrb[21].mxu1  ;;  %v3080_v63 = vpop.f32.mrb[22].mxu0 }
 0x129   : > { %v3143_v34 = vadd.f32 %v3142_v62, %v3141_v58  ;;  %v3144_v0 = vpop.f32.mrb[22].mxu1  ;;  %v3081_v1 = vpop.f32.mrb[23].mxu0 }
 0x12a   : > { %v1937_v4 = vadd.f32 %v3079_v60, %v4175_v21  ;;  %v3082_v5 = vadd.f32 %v3081_v1, %v3080_v63  ;;  %v3145_v7 = vpop.f32.mrb[23].mxu1 }
 0x12b   : > { %v3146_v8 = vadd.f32 %v3145_v7, %v3144_v0 }
 0x12c   : > { %v4217_v9 = vadd.f32 %v3143_v34, %v1937_v4  ;;  %v1940_v11 = vadd.f32 %v3082_v5, %v4175_v21  ;;  %v840_v5 = vsel %vm469_vm0, %v4102_v56, 0 }
 0x12e   : > { %v4221_v13 = vadd.f32 %v3146_v8, %v1940_v11  ;;  %v3083_v14 = vpop.f32.mrb[24].mxu0  ;;  %3398 = vmatpush3.bf16.xpose.msra.mxu0 %v840_v5 }
 0x12f   : > { %v3147_v15 = vpop.f32.mrb[24].mxu1  ;;  %v3084_v16 = vpop.f32.mrb[25].mxu0  ;;  %3399 = vmatprep.subr.bf16.mxu0 %v3667_v49 }
 0x130   : > { %v3085_v17 = vadd.f32 %v3084_v16, %v3083_v14  ;;  %v3148_v18 = vpop.f32.mrb[25].mxu1  ;;  %v3086_v39 = vpop.f32.mrb[26].mxu0 }
 0x131   : > { %v3149_v19 = vadd.f32 %v3148_v18, %v3147_v15  ;;  %v3150_v20 = vpop.f32.mrb[26].mxu1  ;;  %v3087_v22 = vpop.f32.mrb[27].mxu0 }
 0x132   : > { %v1945_v24 = vadd.f32 %v3085_v17, %v4175_v21  ;;  %v3088_v25 = vadd.f32 %v3087_v22, %v3086_v39  ;;  %v3151_v26 = vpop.f32.mrb[27].mxu1 }
 0x133   : > { %v3152_v28 = vadd.f32 %v3151_v26, %v3150_v20 }
 0x134   : > { %v4226_v30 = vadd.f32 %v3149_v19, %v1945_v24  ;;  %v1948_v31 = vadd.f32 %v3088_v25, %v4175_v21 }
 0x136   : > { %v4230_v32 = vadd.f32 %v3152_v28, %v1948_v31  ;;  %v3089_v35 = vpop.f32.mrb[28].mxu0 }
 0x137   : > { %v3153_v36 = vpop.f32.mrb[28].mxu1  ;;  %v3090_v38 = vpop.f32.mrb[29].mxu0 }
 0x138   : > { %v3091_v40 = vadd.f32 %v3090_v38, %v3089_v35  ;;  %v3154_v41 = vpop.f32.mrb[29].mxu1  ;;  %v3092_v45 = vpop.f32.mrb[30].mxu0 }
 0x139   : > { %v3155_v42 = vadd.f32 %v3154_v41, %v3153_v36  ;;  %v3156_v43 = vpop.f32.mrb[30].mxu1  ;;  %v3093_v44 = vpop.f32.mrb[31].mxu0 }
 0x13a   : > { %v1953_v47 = vadd.f32 %v3091_v40, %v4175_v21  ;;  %v3094_v48 = vadd.f32 %v3093_v44, %v3092_v45  ;;  %v3157_v52 = vpop.f32.mrb[31].mxu1 }
 0x13b   : > { %v3158_v55 = vadd.f32 %v3157_v52, %v3156_v43 }
 0x13c   : > { %v4235_v58 = vadd.f32 %v3155_v42, %v1953_v47  ;;  %v1956_v59 = vadd.f32 %v3094_v48, %v4175_v21 }
 0x13e   : > { %v4239_v60 = vadd.f32 %v3158_v55, %v1956_v59  ;;  %v3175_v62 = vpop.f32.mrb[32].mxu0 }
 0x13f   : > { %v3239_v63 = vpop.f32.mrb[32].mxu1  ;;  %v3176_v34 = vpop.f32.mrb[33].mxu0 }
 0x140   : > { %v3240_v0 = vpop.f32.mrb[33].mxu1  ;;  %v3177_v1 = vadd.f32 %v3176_v34, %v3175_v62  ;;  %v3178_v3 = vpop.f32.mrb[34].mxu0 }
 0x141   : > { %v3241_v50 = vadd.f32 %v3240_v0, %v3239_v63  ;;  %v3242_v4 = vpop.f32.mrb[34].mxu1  ;;  %v3179_v7 = vpop.f32.mrb[35].mxu0 }
 0x142   : > { %v3243_v8 = vpop.f32.mrb[35].mxu1  ;;  %v2091_v21 = vadd.f32 %v3177_v1, %v4178_v33  ;;  %v3180_v11 = vadd.f32 %v3179_v7, %v3178_v3  ;;  %v843_v33 = vsel %vm469_vm0, %v4116_v61, 0 }
 0x143   : > { %v3244_v14 = vadd.f32 %v3243_v8, %v3242_v4  ;;  %3400 = vmatpush3.bf16.xpose.msra.mxu0 %v843_v33 }
 0x144   : > { %v2094_v15 = vadd.f32 %v3180_v11, %v4184_v37  ;;  %v4245_v16 = vadd.f32 %v3241_v50, %v2091_v21  ;;  %3401 = vmatprep.subr.bf16.mxu0 %v3667_v49 }
 0x146   : > { %v3181_v17 = vpop.f32.mrb[36].mxu0  ;;  %v4248_v39 = vadd.f32 %v3244_v14, %v2094_v15 }
 0x147   : > { %v3245_v18 = vpop.f32.mrb[36].mxu1  ;;  %v3182_v19 = vpop.f32.mrb[37].mxu0 }
 0x148   : > { %v3246_v20 = vpop.f32.mrb[37].mxu1  ;;  %v3183_v56 = vadd.f32 %v3182_v19, %v3181_v17  ;;  %v3184_v23 = vpop.f32.mrb[38].mxu0 }
 0x149   : > { %v3247_v22 = vadd.f32 %v3246_v20, %v3245_v18  ;;  %v3248_v24 = vpop.f32.mrb[38].mxu1  ;;  %v3185_v25 = vpop.f32.mrb[39].mxu0 }
 0x14a   : > { %v3249_v26 = vpop.f32.mrb[39].mxu1  ;;  %v2099_v37 = vadd.f32 %v3183_v56, %v4187_v54  ;;  %v3186_v28 = vadd.f32 %v3185_v25, %v3184_v23  ;;  %v846_v54 = vsel %vm469_vm0, %v4130_v2, 0 }
 0x14b   : > { %v3250_v31 = vadd.f32 %v3249_v26, %v3248_v24  ;;  %3402 = vmatpush3.bf16.xpose.msra.mxu0 %v846_v54 }
 0x14c   : > { %v2102_v35 = vadd.f32 %v3186_v28, %v4190_v57  ;;  %v4254_v36 = vadd.f32 %v3247_v22, %v2099_v37  ;;  %3403 = vmatprep.subr.bf16.mxu0 %v3667_v49 }
 0x14e   : > { %v3187_v38 = vpop.f32.mrb[40].mxu0  ;;  %v4257_v41 = vadd.f32 %v3250_v31, %v2102_v35 }
 0x14f   : > { %v3251_v40 = vpop.f32.mrb[40].mxu1  ;;  %v3188_v45 = vpop.f32.mrb[41].mxu0 }
 0x150   : > { %v3252_v42 = vpop.f32.mrb[41].mxu1  ;;  %v3189_v61 = vadd.f32 %v3188_v45, %v3187_v38  ;;  %v3190_v44 = vpop.f32.mrb[42].mxu0 }
 0x151   : > { %v3253_v43 = vadd.f32 %v3252_v42, %v3251_v40  ;;  %v3254_v46 = vpop.f32.mrb[42].mxu1  ;;  %v3191_v47 = vpop.f32.mrb[43].mxu0 }
 0x152   : > { %v3255_v48 = vpop.f32.mrb[43].mxu1  ;;  %v2107_v57 = vadd.f32 %v3189_v61, %v4193_v10  ;;  %v3192_v52 = vadd.f32 %v3191_v47, %v3190_v44 }
 0x153   : > { %v3256_v55 = vadd.f32 %v3255_v48, %v3254_v46 }
 0x154   : > { %v2110_v59 = vadd.f32 %v3192_v52, %v4196_v12  ;;  %v4263_v62 = vadd.f32 %v3253_v43, %v2107_v57 }
 0x156   : > { %v3193_v63 = vpop.f32.mrb[44].mxu0  ;;  %v4266_v0 = vadd.f32 %v3256_v55, %v2110_v59 }
 0x157   : > { %v3257_v34 = vpop.f32.mrb[44].mxu1  ;;  %v3194_v1 = vpop.f32.mrb[45].mxu0 }
 0x158   : > { %v3258_v50 = vpop.f32.mrb[45].mxu1  ;;  %v3195_v2 = vadd.f32 %v3194_v1, %v3193_v63  ;;  %v3196_v4 = vpop.f32.mrb[46].mxu0 }
 0x159   : > { %v3259_v3 = vadd.f32 %v3258_v50, %v3257_v34  ;;  %v3260_v5 = vpop.f32.mrb[46].mxu1  ;;  %v3197_v10 = vpop.f32.mrb[47].mxu0 }
 0x15a   : > { %v3261_v7 = vpop.f32.mrb[47].mxu1  ;;  %v2115_v8 = vadd.f32 %v3195_v2, %v4199_v27  ;;  %v3198_v21 = vadd.f32 %v3197_v10, %v3196_v4 }
 0x15b   : > { %v3262_v12 = vadd.f32 %v3261_v7, %v3260_v5 }
 0x15c   : > { %v2118_v11 = vadd.f32 %v3198_v21, %v4202_v29  ;;  %v4270_v14 = vadd.f32 %v3259_v3, %v2115_v8 }
 0x15e   : > { %v3199_v15 = vpop.f32.mrb[48].mxu0  ;;  %v4272_v18 = vadd.f32 %v3262_v12, %v2118_v11 }
 0x15f   : > { %v3263_v17 = vpop.f32.mrb[48].mxu1  ;;  %v3200_v19 = vpop.f32.mrb[49].mxu0 }
 0x160   : > { %v3264_v20 = vpop.f32.mrb[49].mxu1  ;;  %v3201_v56 = vadd.f32 %v3200_v19, %v3199_v15  ;;  %v3202_v23 = vpop.f32.mrb[50].mxu0 }
 0x161   : > { %v3265_v22 = vadd.f32 %v3264_v20, %v3263_v17  ;;  %v3266_v24 = vpop.f32.mrb[50].mxu1  ;;  %v3203_v33 = vpop.f32.mrb[51].mxu0 }
 0x162   : > { %v3267_v25 = vpop.f32.mrb[51].mxu1  ;;  %v2123_v27 = vadd.f32 %v3201_v56, %v4208_v51  ;;  %v3204_v26 = vadd.f32 %v3203_v33, %v3202_v23 }
 0x163   : > { %v3268_v37 = vadd.f32 %v3267_v25, %v3266_v24 }
 0x164   : > { %v2126_v29 = vadd.f32 %v3204_v26, %v4212_v53  ;;  %v4276_v28 = vadd.f32 %v3265_v22, %v2123_v27 }
 0x166   : > { %v3205_v31 = vpop.f32.mrb[52].mxu0  ;;  %v4278_v38 = vadd.f32 %v3268_v37, %v2126_v29 }
 0x167   : > { %v3269_v35 = vpop.f32.mrb[52].mxu1  ;;  %v3206_v40 = vpop.f32.mrb[53].mxu0 }
 0x168   : > { %v3270_v45 = vpop.f32.mrb[53].mxu1  ;;  %v3207_v42 = vadd.f32 %v3206_v40, %v3205_v31  ;;  %v3208_v43 = vpop.f32.mrb[54].mxu0 }
 0x169   : > { %v3271_v61 = vadd.f32 %v3270_v45, %v3269_v35  ;;  %v3272_v44 = vpop.f32.mrb[54].mxu1  ;;  %v3209_v46 = vpop.f32.mrb[55].mxu0 }
 0x16a   : > { %v3273_v54 = vpop.f32.mrb[55].mxu1  ;;  %v2131_v51 = vadd.f32 %v3207_v42, %v4217_v9  ;;  %v3210_v47 = vadd.f32 %v3209_v46, %v3208_v43 }
 0x16b   : > { %v3274_v48 = vadd.f32 %v3273_v54, %v3272_v44 }
 0x16c   : > { %v2134_v53 = vadd.f32 %v3210_v47, %v4221_v13  ;;  %v4282_v57 = vadd.f32 %v3271_v61, %v2131_v51 }
 0x16e   : > { %v3211_v52 = vpop.f32.mrb[56].mxu0  ;;  %v4284_v59 = vadd.f32 %v3274_v48, %v2134_v53 }
 0x16f   : > { %v3275_v55 = vpop.f32.mrb[56].mxu1  ;;  %v3212_v63 = vpop.f32.mrb[57].mxu0 }
 0x170   : > { %v3276_v34 = vpop.f32.mrb[57].mxu1  ;;  %v3213_v1 = vadd.f32 %v3212_v63, %v3211_v52  ;;  %v3214_v2 = vpop.f32.mrb[58].mxu0 }
 0x171   : > { %v3277_v50 = vadd.f32 %v3276_v34, %v3275_v55  ;;  %v3278_v3 = vpop.f32.mrb[58].mxu1  ;;  %v3215_v4 = vpop.f32.mrb[59].mxu0 }
 0x172   : > { %v3279_v5 = vpop.f32.mrb[59].mxu1  ;;  %v2139_v9 = vadd.f32 %v3213_v1, %v4226_v30  ;;  %v3216_v10 = vadd.f32 %v3215_v4, %v3214_v2 }
 0x173   : > { %v3280_v7 = vadd.f32 %v3279_v5, %v3278_v3 }
 0x174   : > { %v2142_v13 = vadd.f32 %v3216_v10, %v4230_v32  ;;  %v4288_v8 = vadd.f32 %v3277_v50, %v2139_v9 }
 0x176   : > { %v3217_v21 = vpop.f32.mrb[60].mxu0  ;;  %v4290_v11 = vadd.f32 %v3280_v7, %v2142_v13 }
 0x177   : > { %v3281_v12 = vpop.f32.mrb[60].mxu1  ;;  %v3218_v15 = vpop.f32.mrb[61].mxu0 }
 0x178   : > { %v3282_v17 = vpop.f32.mrb[61].mxu1  ;;  %v3219_v19 = vadd.f32 %v3218_v15, %v3217_v21  ;;  %v3220_v56 = vpop.f32.mrb[62].mxu0 }
 0x179   : > { %v3283_v20 = vadd.f32 %v3282_v17, %v3281_v12  ;;  %v3284_v22 = vpop.f32.mrb[62].mxu1  ;;  %v3221_v23 = vpop.f32.mrb[63].mxu0 }
 0x17a   : > { %v3285_v24 = vpop.f32.mrb[63].mxu1  ;;  %v2147_v30 = vadd.f32 %v3219_v19, %v4235_v58  ;;  %v3222_v33 = vadd.f32 %v3221_v23, %v3220_v56 }
 0x17b   : > { %v3286_v25 = vadd.f32 %v3285_v24, %v3284_v22 }
 0x17c   : > { %v2150_v32 = vadd.f32 %v3222_v33, %v4239_v60  ;;  %v2244_v27 = vadd.f32 %v3283_v20, %v2147_v30 }
 0x17e   : > { %v2247_v37 = vadd.f32 %v3286_v25, %v2150_v32  ;;  %v2606_v25 = vld [vmem:[%s4377_s7] sm:$0x7]  ;;  %v3669_v32 = vmov 0  }
 0x17f   : > { %v3351_v26 = vpop.f32.mrb[64].mxu1  ;;  %3478 = vset.pattern.permute.xlu0 %v3669_v32 }
 0x180   : > { %v2293_v29 = vadd.f32 %v3351_v26, %v4254_v36  ;;  %v2284_v31 = vpop.f32.mrb[65].mxu1  ;;  %2609 = vperm.xlu0 %3478, %v2606_v25  }
 0x181   : > { %v2285_v35 = vadd.f32 %v2284_v31, %v4245_v16  ;;  %v3352_v40 = vpop.f32.mrb[66].mxu1 }
 0x182   : > { %v2296_v45 = vadd.f32 %v3352_v40, %v4257_v41  ;;  %v2287_v42 = vpop.f32.mrb[67].mxu1  ;;  %v2349_v43 = vmax.f32 %v2293_v29, 0.0 }
 0x183   : > { %v2288_v61 = vadd.f32 %v2287_v42, %v4248_v39  ;;  %v2347_v44 = vmax.f32 %v2285_v35, 0.0 }
 0x184   : > { %v2350_v58 = vmax.f32 %v2296_v45, 0.0 }
 0x185   : > { %v2348_v46 = vmax.f32 %v2288_v61, 0.0 }
 0x186   : > { %v2364_v54 = vpack.c.bf16 %v2350_v58, %v2349_v43 }
 0x187   : > { %v2363_v60 = vpack.c.bf16 %v2348_v46, %v2347_v44  ;;  %v3355_v51 = vpop.f32.mrb[68].mxu1 }
 0x188   : > { %v2309_v47 = vadd.f32 %v3355_v51, %v4270_v14  ;;  %v2300_v36 = vpop.f32.mrb[69].mxu1 }
 0x189   : > { %v2301_v48 = vadd.f32 %v2300_v36, %v4263_v62  ;;  %v3356_v16 = vpop.f32.mrb[70].mxu1  ;;  %3373 = vmatprep.mubr.msk.bf16.mxu1 %vm2410_vm1, %v2363_v60 }
 0x18a   : > { %v2312_v41 = vadd.f32 %v3356_v16, %v4272_v18  ;;  %v2303_v53 = vpop.f32.mrb[71].mxu1  ;;  %3374 = vmatmul.mubr.msk.bf16.vlgmr.msra.gmra.mrb[80].mxu1 %vm2410_vm1, %v2364_v54  ;;  %v2353_v52 = vmax.f32 %v2309_v47, 0.0 }
 0x18b   : > { %v2304_v39 = vadd.f32 %v2303_v53, %v4266_v0  ;;  %v2351_v63 = vmax.f32 %v2301_v48, 0.0 }
 0x18c   : > { %v2354_v55 = vmax.f32 %v2312_v41, 0.0 }
 0x18d   : > { %v2352_v34 = vmax.f32 %v2304_v39, 0.0 }
 0x18e   : > { %v2366_v1 = vpack.c.bf16 %v2354_v55, %v2353_v52 }
 0x18f   : > { %v2365_v50 = vpack.c.bf16 %v2352_v34, %v2351_v63  ;;  %v3359_v14 = vpop.f32.mrb[72].mxu1 }
 0x190   : > { %v2325_v2 = vadd.f32 %v3359_v14, %v4282_v57  ;;  %v2316_v62 = vpop.f32.mrb[73].mxu1 }
 0x191   : > { %v2317_v3 = vadd.f32 %v2316_v62, %v4276_v28  ;;  %v3360_v4 = vpop.f32.mrb[74].mxu1  ;;  %3377 = vmatprep.mubr.msk.bf16.mxu1 %vm2410_vm1, %v2365_v50 }
 0x192   : > { %v2328_v18 = vadd.f32 %v3360_v4, %v4284_v59  ;;  %v2319_v5 = vpop.f32.mrb[75].mxu1  ;;  %3378 = vmatmul.mubr.msk.bf16.gmra.mrb[84].mxu1 %vm2410_vm1, %v2366_v1  ;;  %v2357_v9 = vmax.f32 %v2325_v2, 0.0 }
 0x193   : > { %v2320_v0 = vadd.f32 %v2319_v5, %v4278_v38  ;;  %v2355_v7 = vmax.f32 %v2317_v3, 0.0 }
 0x194   : > { %v2358_v10 = vmax.f32 %v2328_v18, 0.0 }
 0x195   : > { %v2356_v13 = vmax.f32 %v2320_v0, 0.0 }
 0x196   : > { %v2368_v21 = vpack.c.bf16 %v2358_v10, %v2357_v9 }
 0x197   : > { %v2367_v12 = vpack.c.bf16 %v2356_v13, %v2355_v7  ;;  %v3363_v57 = vpop.f32.mrb[76].mxu1 }
 0x198   : > { %v2341_v15 = vadd.f32 %v3363_v57, %v2244_v27  ;;  %v2332_v17 = vpop.f32.mrb[77].mxu1 }
 0x199   : > { %v2333_v28 = vadd.f32 %v2332_v17, %v4288_v8  ;;  %v3364_v19 = vpop.f32.mrb[78].mxu1  ;;  %3381 = vmatprep.mubr.msk.bf16.mxu1 %vm2410_vm1, %v2367_v12  ;;  %v849_v8 = vsel %vm469_vm0, %v4141_v6, 0  ;;  %v2941_v6 = vld [vmem:[%s4375_s5] ss:$0 sm:$0xff] }
 0x19a   : > { %v2344_v59 = vadd.f32 %v3364_v19, %v2247_v37  ;;  %v2335_v20 = vpop.f32.mrb[79].mxu1  ;;  %3382 = vmatmul.mubr.msk.bf16.gmra.mrb[88].mxu1 %vm2410_vm1, %v2368_v21  ;;  %v2361_v56 = vmax.f32 %v2341_v15, 0.0  ;;  %3404 = vmatpush3.bf16.xpose.msra.mxu0 %v849_v8 }
 0x19b   : > { %v2336_v38 = vadd.f32 %v2335_v20, %v4290_v11  ;;  %v2359_v23 = vmax.f32 %v2333_v28, 0.0  ;;  %3409 = vmatprep.subr.bf16.mxu0 %v3667_v49  ;;  %v2565_v11 = vld [vmem:[%s4378_s8] sm:$0x3] }
 0x19c   : > { %v2362_v22 = vmax.f32 %v2344_v59, 0.0 }
 0x19d   : > { %v2360_v24 = vmax.f32 %v2336_v38, 0.0 }
 0x19e   : > { %v2370_v30 = vpack.c.bf16 %v2362_v22, %v2361_v56 }
 0x19f   : > { %v2369_v33 = vpack.c.bf16 %v2360_v24, %v2359_v23 }
 0x1a1   : > { %3385 = vmatprep.mubr.msk.bf16.mxu1 %vm2410_vm1, %v2369_v33  ;;  %3406 = vmatmul.mubr.bf16.vlgmr.msra.gmra.mrb[64].mxu0 %v2565_v11 }
 0x1a2   : > { %3386 = vmatmul.mubr.msk.bf16.gmra.mrb[92].mxu1 %vm2410_vm1, %v2370_v30  ;;  %3425 = vmatprep.mubr.msk.bf16.mxu0 %vm3668_vm2, %v3667_v49 }
 0x25d   : > { %v3375_v27 = vpop.f32.mrb[80].mxu1 }
 0x25e   : > { %v2478_v26 = vadd.f32 %v3375_v27, %v2941_v6  ;;  %v2469_v37 = vpop.f32.mrb[81].mxu1 }
 0x25f   : > { %v2470_v29 = vadd.f32 %v2941_v6, %v2469_v37  ;;  %v3376_v31 = vpop.f32.mrb[82].mxu1  ;;  %v2610_v37 = vpop.permute.xlu0 %2609 }
 0x260   : > { %v2481_v35 = vadd.f32 %v3376_v31, %v2941_v6  ;;  %v2472_v40 = vpop.f32.mrb[83].mxu1  ;;  %v2534_v42 = vmax.f32 %v2478_v26, 0.0  ;;  %v2556_v26 = vld [vmem:[%s4376_s6] sm:$0x3] }
 0x261   : > { %v2473_v45 = vadd.f32 %v2941_v6, %v2472_v40  ;;  %v2532_v43 = vmax.f32 %v2470_v29, 0.0 }
 0x262   : > { %v2535_v61 = vmax.f32 %v2481_v35, 0.0 }
 0x263   : > { %v2533_v58 = vmax.f32 %v2473_v45, 0.0 }
 0x264   : > { %v2549_v44 = vpack.c.bf16 %v2535_v61, %v2534_v42 }
 0x265   : > { %v2548_v46 = vpack.c.bf16 %v2533_v58, %v2532_v43  ;;  %v3379_v54 = vpop.f32.mrb[84].mxu1 }
 0x266   : > { %v2494_v60 = vadd.f32 %v3379_v54, %v2941_v6  ;;  %v2485_v51 = vpop.f32.mrb[85].mxu1  ;;  %v2619_v4 = vsel %vm2410_vm1, %v2549_v44, 0 }
 0x267   : > { %v2486_v47 = vadd.f32 %v2941_v6, %v2485_v51  ;;  %v3380_v36 = vpop.f32.mrb[86].mxu1  ;;  %v2616_v48 = vsel %vm2410_vm1, %v2548_v46, 0 }
 0x268   : > { %v2497_v16 = vadd.f32 %v3380_v36, %v2941_v6  ;;  %v2488_v41 = vpop.f32.mrb[87].mxu1  ;;  %3410 = vmatpush3.bf16.xpose.msra.mxu0 %v2616_v48  ;;  %v2538_v39 = vmax.f32 %v2494_v60, 0.0 }
 0x269   : > { %v2489_v53 = vadd.f32 %v2941_v6, %v2488_v41  ;;  %3411 = vmatprep.subr.bf16.mxu0 %v3667_v49  ;;  %v2536_v55 = vmax.f32 %v2486_v47, 0.0 }
 0x26a   : > { %v2539_v52 = vmax.f32 %v2497_v16, 0.0 }
 0x26b   : > { %v2537_v63 = vmax.f32 %v2489_v53, 0.0 }
 0x26c   : > { %v2551_v34 = vpack.c.bf16 %v2539_v52, %v2538_v39 }
 0x26d   : > { %v2550_v1 = vpack.c.bf16 %v2537_v63, %v2536_v55  ;;  %v3383_v50 = vpop.f32.mrb[88].mxu1 }
 0x26e   : > { %v2510_v14 = vadd.f32 %v3383_v50, %v2941_v6  ;;  %v2501_v2 = vpop.f32.mrb[89].mxu1  ;;  %v2625_v11 = vsel %vm2410_vm1, %v2551_v34, 0 }
 0x26f   : > { %v2502_v62 = vadd.f32 %v2941_v6, %v2501_v2  ;;  %v3384_v3 = vpop.f32.mrb[90].mxu1  ;;  %v2622_v59 = vsel %vm2410_vm1, %v2550_v1, 0 }
 0x270   : > { %v2513_v18 = vadd.f32 %v3384_v3, %v2941_v6  ;;  %v2504_v5 = vpop.f32.mrb[91].mxu1  ;;  %3412 = vmatpush3.bf16.xpose.msra.mxu0 %v2619_v4  ;;  %v2542_v9 = vmax.f32 %v2510_v14, 0.0 }
 0x271   : > { %v2505_v0 = vadd.f32 %v2941_v6, %v2504_v5  ;;  %3413 = vmatprep.subr.bf16.mxu0 %v3667_v49  ;;  %v2540_v7 = vmax.f32 %v2502_v62, 0.0 }
 0x272   : > { %v2543_v10 = vmax.f32 %v2513_v18, 0.0 }
 0x273   : > { %v2541_v13 = vmax.f32 %v2505_v0, 0.0 }
 0x274   : > { %v2553_v21 = vpack.c.bf16 %v2543_v10, %v2542_v9 }
 0x275   : > { %v2552_v12 = vpack.c.bf16 %v2541_v13, %v2540_v7  ;;  %v3387_v57 = vpop.f32.mrb[92].mxu1 }
 0x276   : > { %v2526_v15 = vadd.f32 %v3387_v57, %v2941_v6  ;;  %v2517_v17 = vpop.f32.mrb[93].mxu1  ;;  %v2631_v32 = vsel %vm2410_vm1, %v2553_v21, 0 }
 0x277   : > { %v2518_v28 = vadd.f32 %v2941_v6, %v2517_v17  ;;  %v3388_v19 = vpop.f32.mrb[94].mxu1  ;;  %v2628_v25 = vsel %vm2410_vm1, %v2552_v12, 0 }
 0x278   : > { %v2529_v20 = vadd.f32 %v3388_v19, %v2941_v6  ;;  %v2520_v38 = vpop.f32.mrb[95].mxu1  ;;  %3414 = vmatpush3.bf16.xpose.msra.mxu0 %v2622_v59  ;;  %v2546_v22 = vmax.f32 %v2526_v15, 0.0 }
 0x279   : > { %v2521_v56 = vadd.f32 %v2941_v6, %v2520_v38  ;;  %3415 = vmatprep.subr.bf16.mxu0 %v3667_v49  ;;  %v2544_v24 = vmax.f32 %v2518_v28, 0.0 }
 0x27a   : > { %v2547_v23 = vmax.f32 %v2529_v20, 0.0 }
 0x27b   : > { %v2545_v30 = vmax.f32 %v2521_v56, 0.0 }
 0x27c   : > { %v2555_v33 = vpack.c.bf16 %v2547_v23, %v2546_v22 }
 0x27d   : > { %v2554_v8 = vpack.c.bf16 %v2545_v30, %v2544_v24 }
 0x27e   : > { %v2637_v27 = vsel %vm2410_vm1, %v2555_v33, 0 }
 0x27f   : > { %v2634_v6 = vsel %vm2410_vm1, %v2554_v8, 0 }
 0x280   : > { %3416 = vmatpush3.bf16.xpose.msra.mxu0 %v2625_v11 }
 0x281   : > { %3417 = vmatprep.subr.bf16.mxu0 %v3667_v49 }
 0x288   : > { %3418 = vmatpush3.bf16.xpose.msra.mxu0 %v2628_v25 }
 0x289   : > { %3419 = vmatprep.subr.bf16.mxu0 %v3667_v49 }
 0x290   : > { %3420 = vmatpush3.bf16.xpose.msra.mxu0 %v2631_v32 }
 0x291   : > { %3421 = vmatprep.subr.bf16.mxu0 %v3667_v49 }
 0x298   : > { %3422 = vmatpush3.bf16.xpose.msra.mxu0 %v2634_v6 }
 0x299   : > { %3423 = vmatprep.subr.bf16.mxu0 %v3667_v49 }
 0x2a0   : > { %3424 = vmatpush3.bf16.xpose.msra.mxu0 %v2637_v27 }
 0x2a7   : > { %3426 = vmatmul.mubr.msk.bf16.vlgmr.msra.gmra.mrb[64].mxu0 %vm2410_vm1, %v2556_v26 }
 0x37a   : > { %v2673_v49 = vpop.f32.mrb[64].mxu0 }
 0x37b   : > { %v2674_v29 = vadd.f32 %v2673_v49, %v2610_v37  ;;  %v3427_v31 = vpop.f32.mrb[65].mxu0 }
 0x37c   : > { %v2676_v35 = vpop.f32.mrb[66].mxu0 }
 0x37d   : > { %2680 = vst [vmem:[%s411_s27] sm:$0x7] %v2674_v29  ;;  %v3428_v40 = vpop.f32.mrb[67].mxu0 }
 0x37e PF: > { %s19_s13 = sadd.s32 1, %s3665_s13   ;;  %s4380_s30 = smov %s3657_s11 }
 0x37f   : > { %p16_p9 = scmp.ge.s32.totalorder %s19_s13, 6   ;;  %s4381_s10 = smov %s3661_s12 }
 0x380   : > { %s4382_s11 = smov %s4385_s14  ;;  %s4383_s12 = smov %s4389_s15 }
 0x381   :  { %18 = sbr.rel (!%p16_p9) target bundleno = 3 (0x3), region = 89 }

</bundles_post_ra>
